<compile_context>
chip_gen: v5e
topology: v5e:2x2
jax: 0.10.0
libtpu: 0.0.40
codegen_flags: <defaults>
</compile_context>

<pallas_src>
import jax
import jax.numpy as jnp
from jax import lax
from jax.experimental import pallas as pl
from jax.experimental.pallas import tpu as pltpu

_MIN_PALLAS_BYTES = 1 * 1024 * 1024   # below this, Pallas launch overhead dominates
_BLOCK_PARAMS_CACHE = None


def _block_params():
    """(target_block_bytes, vmem_limit_bytes) tuned per TPU generation."""
    global _BLOCK_PARAMS_CACHE
    if _BLOCK_PARAMS_CACHE is None:
        # v5e / v6e (128 MiB VMEM): ~4 MiB blocks already sit at >=86% of roofline.
        target, limit = 4 * 1024 * 1024, 32 * 1024 * 1024
        try:
            vmem = pltpu.get_tpu_info().vmem_capacity_bytes
            if vmem <= 80 * 1024 * 1024:
                # v7x (64 MiB/TC, ~3.2 TB/s): larger blocks amortize the ~0.35 us
                # per-grid-step overhead; 2x(in)+2x(out) 8 MiB buffers = 32 MiB.
                target, limit = 8 * 1024 * 1024, 48 * 1024 * 1024
        except Exception:
            pass  # fall back to conservative defaults (legal on every generation)
        _BLOCK_PARAMS_CACHE = (target, limit)
    return _BLOCK_PARAMS_CACHE


def _scale_kernel(scale_ref, x_ref, o_ref):
    # scale_ref: (1, 1) f32 in SMEM; x_ref / o_ref: (tile_m, lane) in VMEM.
    xf = x_ref[...].astype(jnp.float32)
    o_ref[...] = (xf * scale_ref[0, 0]).astype(o_ref.dtype)


def _make_scale_amax_kernel(m_rows, tile_m):
    """Fused scale + per-block |x| max (saves a full extra HBM pass in training)."""

    def kernel(scale_ref, x_ref, o_ref, amax_ref):
        xf = x_ref[...].astype(jnp.float32)
        o_ref[...] = (xf * scale_ref[0, 0]).astype(o_ref.dtype)
        # Mask rows past the end of the array: the partial last block's extra
        # rows hold stale VMEM (Pallas masks the output store, not this read).
        rows = lax.broadcasted_iota(jnp.int32, xf.shape, 0)
        valid = rows < (m_rows - pl.program_id(0) * tile_m)
        absx = jnp.where(valid, jnp.abs(xf), 0.0)
        # Reduce only across sublanes here; the tiny (num_blocks, 1, lane)
        # partials array is max-reduced outside the kernel.
        amax_ref[...] = jnp.max(absx, axis=0, keepdims=True)[None]

    return kernel


def _pallas_scale(x, scale_f32, compute_amax, donate_input):
    orig_shape, orig_dtype = x.shape, x.dtype
    total = x.size
    itemsize = jnp.dtype(orig_dtype).itemsize

    # Widest lane-dense last dim (multiple of 128) dividing the flat size:
    # unmasked vst stores, zero pad/slice HBM copies.
    lane = next(l for l in (512, 256, 128) if total % l == 0)
    m = total // lane
    x2 = x.reshape(m, lane)

    target_bytes, vmem_limit = _block_params()
    tile_m = max(32, (target_bytes // (lane * itemsize)) // 32 * 32)
    # Guarantee >=2 grid blocks so the "parallel" axis splits across both v7x
    # TensorCores and double-buffering is always active.
    half_m = (((m + 1) // 2) + 31) // 32 * 32
    tile_m = min(tile_m, max(32, half_m), m)
    num_blocks = pl.cdiv(m, tile_m)

    scale2 = scale_f32.reshape(1, 1)
    x_spec = pl.BlockSpec((tile_m, lane), lambda i: (i, 0))
    in_specs = [pl.BlockSpec(memory_space=pltpu.MemorySpace.SMEM), x_spec]
    cparams = pltpu.CompilerParams(
        dimension_semantics=("parallel",), vmem_limit_bytes=vmem_limit)
    # Opt-in HBM aliasing: only a win when the caller donates x; otherwise XLA
    # would insert a defensive copy, so the default stays off.
    io_alias = {1: 0} if donate_input else {}
    bytes_accessed = 2 * total * itemsize + (num_blocks * lane * 4 if compute_amax else 0)
    cost = pl.CostEstimate(flops=total, transcendentals=0, bytes_accessed=bytes_accessed)

    if compute_amax:
        out2, partials = pl.pallas_call(
            _make_scale_amax_kernel(m, tile_m),
            out_shape=(jax.ShapeDtypeStruct((m, lane), orig_dtype),
                       jax.ShapeDtypeStruct((num_blocks, 1, lane), jnp.float32)),
            grid=(num_blocks,),
            in_specs=in_specs,
            out_specs=(x_spec, pl.BlockSpec((1, 1, lane), lambda i: (i, 0, 0))),
            compiler_params=cparams,
            cost_estimate=cost,
            input_output_aliases=io_alias,
        )(scale2, x2)
        return out2.reshape(orig_shape), jnp.max(partials)

    out2 = pl.pallas_call(
        _scale_kernel,
        out_shape=jax.ShapeDtypeStruct((m, lane), orig_dtype),
        grid=(num_blocks,),
        in_specs=in_specs,
        out_specs=x_spec,
        compiler_params=cparams,
        cost_estimate=cost,
        input_output_aliases=io_alias,
    )(scale2, x2)
    return out2.reshape(orig_shape), None


def _fp8_scale_impl(x, scale, compute_amax, donate_input=False):
    orig_dtype = x.dtype
    total = x.size
    itemsize = jnp.dtype(orig_dtype).itemsize
    scale_f32 = jnp.asarray(scale, jnp.float32)

    def _xla_path():
        out = (x.astype(jnp.float32) * scale_f32).astype(orig_dtype)
        if not compute_amax:
            return out, None
        amax = (jnp.max(jnp.abs(x.astype(jnp.float32)))
                if total > 0 else jnp.float32(0.0))
        return out, amax

    if total == 0 or total * itemsize < _MIN_PALLAS_BYTES:
        # Tiny activations: a fused XLA multiply beats Pallas launch overhead.
        return _xla_path()
    if total % 128 != 0:
        # Ragged flat size: a plain fused multiply is one read+write HBM pass,
        # strictly cheaper than pad + kernel + slice copies.
        return _xla_path()
    return _pallas_scale(x, scale_f32, compute_amax, donate_input)


def fp8_scale_forward(x, scale, *, donate_input=False):
    """Applies `x * scale` (FP8ScalingFactor.forward) with a Pallas kernel."""
    out, _ = _fp8_scale_impl(x, scale, compute_amax=False, donate_input=donate_input)
    return out


def fp8_scale_forward_with_amax(x, scale, *, donate_input=False):
    """Fused `x * scale` and amax(|x|) in a single HBM pass (training path)."""
    return _fp8_scale_impl(x, scale, compute_amax=True, donate_input=donate_input)


class FP8ScalingFactor:
    """JAX port of the PyTorch FP8ScalingFactor module (Pallas hot path)."""

    def __init__(self, init_scale=1.0, amax_history_len=16, scale_update_freq=1000,
                 fp8_max=448.0):
        self.init_scale = init_scale
        self.amax_history_len = amax_history_len
        self.scale_update_freq = scale_update_freq
        self.fp8_max = fp8_max  # 448.0 = e4m3 max; use 57344.0 for e5m2 targets.
        self.training = True
        # Buffers (deterministic init, matching the PyTorch register_buffer calls).
        self.scale = jnp.asarray(init_scale, dtype=jnp.float32)
        self.amax_history = jnp.zeros((amax_history_len,), dtype=jnp.float32)
        self.step = jnp.zeros((1,), dtype=jnp.int32)
        # TODO(synk): buffers are host-side Python attributes; under jit/pmap the
        # in-place updates in update_scale will not propagate per-device state.

    def update_scale(self, tensor=None, amax=None):
        """Device-side amax tracking / scale update (no host round-trips)."""
        if not self.training:
            return
        if amax is None:
            if tensor is None:
                raise ValueError("update_scale needs a tensor or a precomputed amax")
            amax = jnp.max(jnp.abs(tensor.astype(jnp.float32)))
        amax = jnp.asarray(amax, jnp.float32)
        step = self.step[0]
        idx = step % self.amax_history_len
        hist = self.amax_history.at[idx].set(amax)
        self.amax_history = hist
        # Masked (not prefix-sliced) max: robust to zero entries in the history.
        has_valid = jnp.any(hist != 0.0)
        masked_max = jnp.max(jnp.where(hist != 0.0, hist, -jnp.inf))
        do_update = (step % self.scale_update_freq == 0) & (step > 0) & has_valid
        self.scale = jnp.where(do_update, self.fp8_max / masked_max,
                               self.scale).astype(jnp.float32)
        self.step = self.step + 1

    def forward(self, tensor):
        return fp8_scale_forward(tensor, self.scale)

    def forward_and_update(self, tensor):
        """Fused forward + amax (single read pass) feeding the scale update."""
        if not self.training:
            return self.forward(tensor)
        out, amax = fp8_scale_forward_with_amax(tensor, self.scale)
        self.update_scale(amax=amax)
        return out

    def backward(self, tensor):
        """Inverse scaling for the backward pass (tensor / scale)."""
        inv_scale = jnp.float32(1.0) / self.scale
        return fp8_scale_forward(tensor, inv_scale)

    __call__ = forward


if __name__ == "__main__":
    key = jax.random.PRNGKey(0)
    k1, k2, k3 = jax.random.split(key, 3)

    mod = FP8ScalingFactor(init_scale=1.5)

    # 2 MiB lane-aligned activation: takes the Pallas kernel path (>=2 blocks).
    x = jax.random.normal(k1, (4, 256, 512), dtype=jnp.float32)
    out = jax.block_until_ready(mod(x))
    ref = x * mod.scale
    assert out.shape == x.shape and out.dtype == x.dtype
    assert jnp.allclose(out, ref, rtol=1e-6, atol=1e-6), "forward mismatch"

    # Fused forward + amax (single HBM read pass) vs separate reference ops.
    out_f, amax = fp8_scale_forward_with_amax(x, mod.scale)
    jax.block_until_ready(out_f)
    assert jnp.allclose(out_f, ref, rtol=1e-6, atol=1e-6), "fused forward mismatch"
    assert jnp.allclose(amax, jnp.max(jnp.abs(x)), rtol=1e-6, atol=1e-6), "amax mismatch"

    # Device-side bookkeeping via the fused path.
    y = jax.block_until_ready(mod.forward_and_update(x))
    assert int(mod.step[0]) == 1

    # Small NCHW activation: early-exits to the fused XLA multiply path.
    x_small = jax.random.normal(k2, (2, 4, 16, 16), dtype=jnp.float32)
    out_small = jax.block_until_ready(mod(x_small))
    assert out_small.shape == x_small.shape and out_small.dtype == x_small.dtype
    assert jnp.allclose(out_small, x_small * mod.scale, rtol=1e-6, atol=1e-6)

    # Odd (ragged) shape: handled by the XLA fallback path.
    x_odd = jax.random.normal(k3, (3, 5, 7), dtype=jnp.float32)
    out_odd = jax.block_until_ready(mod(x_odd))
    assert jnp.allclose(out_odd, x_odd * mod.scale, rtol=1e-6, atol=1e-6)

    # Inverse-scaling (backward) path.
    back = jax.block_until_ready(mod.backward(out))
    assert jnp.allclose(back, x, rtol=1e-5, atol=1e-5), "backward mismatch"

    print("KERNEL_OK")
</pallas_src>

<mosaic_0001>
module attributes {stable_mosaic.version = 11 : i64} {
  func.func @_scale_kernel(%arg0: i32, %arg1: memref<1x1xf32, #tpu.memory_space<smem>>, %arg2: memref<512x512xf32, #tpu.memory_space<vmem>>, %arg3: memref<512x512xf32, #tpu.memory_space<vmem>>) attributes {dimension_semantics = [#tpu.dimension_semantics<parallel>], iteration_bounds = array<i64: 2>, scalar_prefetch = 0 : i64, scratch_operands = 0 : i64, tpu.core_type = #tpu.core_type<tc>, window_params = [{transform_indices = @transform_0, window_bounds = array<i64: 1, 1>}, {transform_indices = @transform_1, window_bounds = array<i64: 512, 512>}, {transform_indices = @transform_2, window_bounds = array<i64: 512, 512>}]} {
    %c0 = arith.constant 0 : index
    %c0_0 = arith.constant 0 : index
    %0 = vector.load %arg2[%c0, %c0_0] : memref<512x512xf32, #tpu.memory_space<vmem>>, vector<512x512xf32>
    %c0_1 = arith.constant 0 : index
    %c0_2 = arith.constant 0 : index
    %1 = memref.load %arg1[%c0_1, %c0_2] : memref<1x1xf32, #tpu.memory_space<smem>>
    %2 = vector.broadcast %1 : f32 to vector<512x512xf32>
    %3 = arith.mulf %0, %2 : vector<512x512xf32>
    %c0_3 = arith.constant 0 : index
    %c0_4 = arith.constant 0 : index
    %4 = vector.load %arg3[%c0_3, %c0_4] : memref<512x512xf32, #tpu.memory_space<vmem>>, vector<512x512xf32>
    tpu.vector_store %arg3[%c0_3, %c0_4], %3 {strides = array<i32>} : memref<512x512xf32, #tpu.memory_space<vmem>>, vector<512x512xf32>,
    return
  }
  func.func @transform_0(%arg0: i32) -> (i32, i32) {
    %c0_i32 = arith.constant 0 : i32
    %c0_i32_0 = arith.constant 0 : i32
    %c0_i32_1 = arith.constant 0 : i32
    return %c0_i32, %c0_i32_0 : i32, i32
  }
  func.func @transform_1(%arg0: i32) -> (i32, i32) {
    %c0_i32 = arith.constant 0 : i32
    %c0_i32_0 = arith.constant 0 : i32
    return %arg0, %c0_i32 : i32, i32
  }
  func.func @transform_2(%arg0: i32) -> (i32, i32) {
    %c0_i32 = arith.constant 0 : i32
    %c0_i32_0 = arith.constant 0 : i32
    return %arg0, %c0_i32 : i32, i32
  }
}

</mosaic_0001>

<bundles_post_ra>
// kernel: tpu_custom_call.1
= control target key start
LH: loop header
LB: loop body
LE: loop exit
PB: predicated region body
PF: predicated region fallthrough
CT: control target
= control target key end

     0   :  { %s2120_s0 = inlined_call_operand.<no memory space> [shape: f32[1,1], index: 0, kind: input, shape index: {}]   ;;  %s2121_s1 = inlined_call_operand.hbm [shape: f32[1024,512], index: 1, kind: input, shape index: {}]   ;;  %s2122_s2 = inlined_call_operand.hbm [shape: f32[1024,512], index: 2, kind: output, shape index: {}]  }
   0x1   :  { %7 = sst [smem:[#allocation2]] %s2120_s0 }
   0x2   :  { %8 = vsyncpa [#allocation4], 0 }
   0x3   :  { %10 = vsyncpa [#allocation4 + $0x1], 0 }
   0x4   :  { %11 = vsyncpa [#allocation5], 0 }
   0x5   :  { %13 = vsyncpa [#allocation5 + $0x1], 0  ;;  %s1218_s11 = smov 0   ;;  %s1220_s12 = smov 0  }
   0x6   :  { %s1222_s13 = smov 0   ;;  %s1224_s14 = smov 0  }
   0x7 LB: > { %s1239_s0 = sadd.s32 4294967295, %s1194_s14   ;;  %s1028_s15 = sadd.s32 4294967294, %s1194_s14   ;;  %s1194_s14 = sphi %s1224_s14, %s2132_s14   ;;  %s1190_s13 = sphi %s1222_s13, %s2131_s13   ;;  %s1186_s12 = sphi %s1220_s12, %s2130_s12   ;;  %s1182_s11 = sphi %s1218_s11, %s2129_s11  }
   0x8   : > { %s1243_s16 = sadd.s32 1, %s1194_s14   ;;  %s47_s17 = sadd.s32 1, %s1190_s13 }
   0x9   : > { %s44_s18 = ssub.s32 %s1194_s14, %s1243_s16  ;;  %p54_p0 = scmp.ne.s32.totalorder %s1190_s13, %s1186_s12 }
   0xa   : > { %p45_p1 = scmp.eq.s32.totalorder %s44_s18, 0  ;;  %p55_p2 = scmp.eq.s32.totalorder %s1194_s14, 0 }
   0xb   : > { %p60_p3 = scmp.ne.s32.totalorder %s1186_s12, %s1182_s11  ;;  %p61_p4 = scmp.eq.s32.totalorder %s1239_s0, 0 }
   0xc   : > { %s1255_s19 = scalar_select %p45_p1, %s1190_s13, %s47_s17  }
   0xd   : > { %p1257_p5 = por %p55_p2, %p54_p0  ;;  %p1261_p6 = por %p61_p4, %p60_p3 }
   0xe   : > { %p84_p7 = scmp.eq.s32.totalorder %s1239_s0, 1  ;;  %p90_p8 = scmp.eq.s32.totalorder %s1028_s15, 1 }
   0xf   : > { %p1060_p10 = scmp.lt.s32.totalorder %s1194_s14, 2  ;;  %s113_s24 = sand.u32 1, %s1190_s13  }
  0x10   : > { %p1268_p11 = por %p84_p7, %p54_p0  ;;  %p1272_p12 = por %p90_p8, %p60_p3 }
  0x11   : > { %s1045_s25 = sshll.u32 %s1194_s14, 11  ;;  %s1031_s26 = sshll.u32 %s113_s24, 11 }
  0x12   : > { %s123_s29 = scalar_lea.hbm %s2121_s1, %s1045_s25  ;;  %s117_s3 = scalar_lea.vmem [#allocation3], %s1031_s26 }
  0x13   : > { %s124_s30 = sshll.u32 %s123_s29, 4  ;;  %s126_s4 = sshll.u32 %s117_s3, 4  ;;  %s125_s30 = int_to_ptr.hbm [resolvable:$true] %s124_s30  ;;  %s127_s4 = int_to_ptr.vmem [resolvable:$true] %s126_s4 }
  0x14   : > { %p1283_p13 = pnand %p1060_p10, %p1257_p5  ;;  %p1035_p0 = scmp.ge.s32.totalorder %s1194_s14, 1 }
  0x15   : > { %p134_p1 = scmp.lt.s32.totalorder %s1194_s14, 3  ;;  %s114_s6 = scalar_lea.sflag [#allocation4], %s113_s24 }
  0x16   : > { %s1098_s7 = sshra.s32 %s125_s30, 4  ;;  %p1102_p3 = pneg %p1283_p13  ;;  %s1099_s7 = int_to_ptr.hbm [resolvable:$true] %s1098_s7 }
  0x17   : > { %s1100_s8 = scalar_lea.hbm %s1099_s7, 2048  ;;  %s1105_s15 = scalar_lea.hbm %s2121_s1, 4096 }
  0x18   : > { %p1101_p2 = scmp.ne.s32.totalorder %s1099_s7, %s1100_s8  ;;  %p1106_p5 = scmp.lt.s32.totalorder %s1099_s7, %s2121_s1 }
  0x19   : > { %p1107_p8 = scmp.lt.s32.totalorder %s1105_s15, %s1100_s8 }
  0x1a   : > { %p1103_p4 = pnand %p1102_p3, %p1101_p2 }
  0x1b   : > { %p1108_p10 = por %p1107_p8, %p1106_p5 }
  0x1c   : > { %p1104_p7 = pneg %p1103_p4 }
  0x1e   : > { %p1109_p9 = pnand %p1108_p10, %p1104_p7 }
  0x20   : > { %1112 = shalt.err (!%p1109_p9)
}
  0x21   : > { %s1196_s20 = smov 512   ;;  %s1197_s24 = smov 32  }
  0x22   : > { %1055 = dma.hbm_to_vmem [thread:$0]  (!%p1283_p13), %s125_s30, 32768, %s127_s4, %s114_s6, %s1196_s20, %s1196_s20, %s1197_s24  }
  0x23   : > { %p135_p2 = pnand %p1035_p0, %p134_p1 }
  0x24   : > { %s1304_s25 = sand.u32 (!%p135_p2), 1, %s1186_s12  }
  0x25   : > { %138 = sbr.rel (%p135_p2) target bundleno = 311 (0x137), region = 28  ;;  %s1036_s26 = sshll.u32 (!%p135_p2), %s1304_s25, 11 }
  0x26   : > { %s141_s27 = scalar_lea.sflag (!%p135_p2), [#allocation4], %s1304_s25  ;;  %s1308_s28 = scalar_lea.vmem (!%p135_p2), [#allocation3], %s1036_s26 }
  0x2a   : > { %1173 = dma.done.wait (%p1261_p6), %s141_s27, 32768  }
  0x2b   : > { %1175 = vsyncadd (%p1261_p6), %s141_s27, 4294934528  ;;  %s424_s29 = sld [smem:[#allocation2]]  ;;  %v168_v0 = vld [vmem:[%s1308_s28] sm:$0xff]  ;;  %v169_v2 = vld [vmem:[%s1308_s28 + $0x8] sm:$0xff]  ;;  %s1327_s21 = scalar_lea.vmem [#allocation6], %s1036_s26 }
  0x2c   : > { %v170_v3 = vld [vmem:[%s1308_s28 + $0x10] sm:$0xff]  ;;  %v171_v7 = vld [vmem:[%s1308_s28 + $0x18] sm:$0xff]  ;;  %v172_v8 = vld [vmem:[%s1308_s28 + $0x20] sm:$0xff]  ;;  %s1047_s30 = sshll.u32 %s1239_s0, 11  ;;  %s952_s5 = sshll.u32 %s1327_s21, 4  ;;  %s953_s5 = int_to_ptr.vmem [resolvable:$true] %s952_s5 }
  0x2d   : > { %v173_v9 = vld [vmem:[%s1308_s28 + $0x28] sm:$0xff]  ;;  %v174_v11 = vld [vmem:[%s1308_s28 + $0x30] sm:$0xff]  ;;  %v175_v13 = vld [vmem:[%s1308_s28 + $0x38] sm:$0xff]  ;;  %s951_s0 = scalar_lea.hbm %s2122_s2, %s1047_s30  ;;  %s939_s7 = scalar_lea.sflag [#allocation5], %s1304_s25 }
  0x2e   : > { %v176_v15 = vld [vmem:[%s1308_s28 + $0x40] sm:$0xff]  ;;  %v177_v17 = vld [vmem:[%s1308_s28 + $0x48] sm:$0xff]  ;;  %v178_v19 = vld [vmem:[%s1308_s28 + $0x50] sm:$0xff]  ;;  %s954_s6 = sshll.u32 %s951_s0, 4  ;;  %s1148_s17 = scalar_lea.hbm %s2122_s2, 4096  ;;  %s955_s6 = int_to_ptr.hbm [resolvable:$true] %s954_s6 }
  0x2f   : > { %v179_v21 = vld [vmem:[%s1308_s28 + $0x58] sm:$0xff]  ;;  %v180_v23 = vld [vmem:[%s1308_s28 + $0x60] sm:$0xff]  ;;  %v181_v25 = vld [vmem:[%s1308_s28 + $0x68] sm:$0xff]  ;;  %s1142_s8 = sshra.s32 %s955_s6, 4  ;;  %s1143_s8 = int_to_ptr.hbm [resolvable:$true] %s1142_s8 }
  0x30   : > { %v182_v27 = vld [vmem:[%s1308_s28 + $0x70] sm:$0xff]  ;;  %v183_v29 = vld [vmem:[%s1308_s28 + $0x78] sm:$0xff]  ;;  %v184_v31 = vld [vmem:[%s1308_s28 + $0x80] sm:$0xff]  ;;  %s1144_s9 = scalar_lea.hbm %s1143_s8, 2048  ;;  %p1149_p0 = scmp.lt.s32.totalorder %s1143_s8, %s2122_s2 }
  0x31   : > { %v1315_v1 = vstv %s424_s29  ;;  %v185_v33 = vld [vmem:[%s1308_s28 + $0x88] sm:$0xff]  ;;  %v186_v35 = vld [vmem:[%s1308_s28 + $0x90] sm:$0xff]  ;;  %v187_v37 = vld [vmem:[%s1308_s28 + $0x98] sm:$0xff]  ;;  %p1145_p6 = scmp.ne.s32.totalorder %s1143_s8, %s1144_s9  ;;  %p1150_p1 = scmp.lt.s32.totalorder %s1148_s17, %s1144_s9 }
  0x32   : > { %v426_v4 = vmul.f32 %v1315_v1, %v168_v0  ;;  %v427_v5 = vmul.f32 %v1315_v1, %v169_v2  ;;  %v428_v6 = vmul.f32 %v1315_v1, %v170_v3  ;;  %v429_v10 = vmul.f32 %v1315_v1, %v171_v7  ;;  %v188_v39 = vld [vmem:[%s1308_s28 + $0xa0] sm:$0xff]  ;;  %v189_v41 = vld [vmem:[%s1308_s28 + $0xa8] sm:$0xff]  ;;  %v190_v43 = vld [vmem:[%s1308_s28 + $0xb0] sm:$0xff] }
  0x33   : > { %v430_v12 = vmul.f32 %v1315_v1, %v172_v8  ;;  %v431_v14 = vmul.f32 %v1315_v1, %v173_v9  ;;  %v432_v16 = vmul.f32 %v1315_v1, %v174_v11  ;;  %v433_v18 = vmul.f32 %v1315_v1, %v175_v13  ;;  %v191_v45 = vld [vmem:[%s1308_s28 + $0xb8] sm:$0xff]  ;;  %v192_v47 = vld [vmem:[%s1308_s28 + $0xc0] sm:$0xff]  ;;  %v193_v49 = vld [vmem:[%s1308_s28 + $0xc8] sm:$0xff]  ;;  %p1146_p9 = pnand %p1145_p6, %p1268_p11  ;;  %p1151_p3 = por %p1150_p1, %p1149_p0 }
  0x34   : > { %682 = vst [vmem:[%s1327_s21] sm:$0xff] %v426_v4  ;;  %v434_v20 = vmul.f32 %v1315_v1, %v176_v15  ;;  %v435_v22 = vmul.f32 %v1315_v1, %v177_v17  ;;  %v436_v24 = vmul.f32 %v1315_v1, %v178_v19  ;;  %v437_v26 = vmul.f32 %v1315_v1, %v179_v21  ;;  %v194_v51 = vld [vmem:[%s1308_s28 + $0xd0] sm:$0xff]  ;;  %v195_v53 = vld [vmem:[%s1308_s28 + $0xd8] sm:$0xff]  ;;  %v196_v55 = vld [vmem:[%s1308_s28 + $0xe0] sm:$0xff] }
  0x35   : > { %683 = vst [vmem:[%s1327_s21 + $0x8] sm:$0xff] %v427_v5  ;;  %v438_v28 = vmul.f32 %v1315_v1, %v180_v23  ;;  %v439_v30 = vmul.f32 %v1315_v1, %v181_v25  ;;  %v440_v32 = vmul.f32 %v1315_v1, %v182_v27  ;;  %v441_v34 = vmul.f32 %v1315_v1, %v183_v29  ;;  %v197_v57 = vld [vmem:[%s1308_s28 + $0xe8] sm:$0xff]  ;;  %v198_v59 = vld [vmem:[%s1308_s28 + $0xf0] sm:$0xff]  ;;  %v199_v61 = vld [vmem:[%s1308_s28 + $0xf8] sm:$0xff]  ;;  %p1147_p13 = pneg %p1146_p9 }
  0x36   : > { %684 = vst [vmem:[%s1327_s21 + $0x10] sm:$0xff] %v428_v6  ;;  %v442_v36 = vmul.f32 %v1315_v1, %v184_v31  ;;  %v443_v38 = vmul.f32 %v1315_v1, %v185_v33  ;;  %v444_v40 = vmul.f32 %v1315_v1, %v186_v35  ;;  %v445_v42 = vmul.f32 %v1315_v1, %v187_v37  ;;  %v200_v63 = vld [vmem:[%s1308_s28 + $0x100] sm:$0xff]  ;;  %v201_v2 = vld [vmem:[%s1308_s28 + $0x108] sm:$0xff]  ;;  %v202_v4 = vld [vmem:[%s1308_s28 + $0x110] sm:$0xff] }
  0x37   : > { %685 = vst [vmem:[%s1327_s21 + $0x18] sm:$0xff] %v429_v10  ;;  %v446_v44 = vmul.f32 %v1315_v1, %v188_v39  ;;  %v447_v46 = vmul.f32 %v1315_v1, %v189_v41  ;;  %v448_v48 = vmul.f32 %v1315_v1, %v190_v43  ;;  %v449_v50 = vmul.f32 %v1315_v1, %v191_v45  ;;  %v203_v6 = vld [vmem:[%s1308_s28 + $0x118] sm:$0xff]  ;;  %v204_v8 = vld [vmem:[%s1308_s28 + $0x120] sm:$0xff]  ;;  %v205_v10 = vld [vmem:[%s1308_s28 + $0x128] sm:$0xff]  ;;  %p1152_p4 = pnand %p1151_p3, %p1147_p13 }
  0x38   : > { %686 = vst [vmem:[%s1327_s21 + $0x20] sm:$0xff] %v430_v12  ;;  %v450_v52 = vmul.f32 %v1315_v1, %v192_v47  ;;  %v451_v54 = vmul.f32 %v1315_v1, %v193_v49  ;;  %v452_v56 = vmul.f32 %v1315_v1, %v194_v51  ;;  %v453_v58 = vmul.f32 %v1315_v1, %v195_v53  ;;  %v206_v12 = vld [vmem:[%s1308_s28 + $0x130] sm:$0xff] }
  0x39   : > { %687 = vst [vmem:[%s1327_s21 + $0x28] sm:$0xff] %v431_v14  ;;  %v454_v60 = vmul.f32 %v1315_v1, %v196_v55  ;;  %v455_v62 = vmul.f32 %v1315_v1, %v197_v57  ;;  %v456_v0 = vmul.f32 %v1315_v1, %v198_v59  ;;  %v457_v3 = vmul.f32 %v1315_v1, %v199_v61  ;;  %v207_v14 = vld [vmem:[%s1308_s28 + $0x138] sm:$0xff] }
  0x3a   : > { %688 = vst [vmem:[%s1327_s21 + $0x30] sm:$0xff] %v432_v16  ;;  %v458_v5 = vmul.f32 %v1315_v1, %v200_v63  ;;  %v459_v7 = vmul.f32 %v1315_v1, %v201_v2  ;;  %v460_v9 = vmul.f32 %v1315_v1, %v202_v4  ;;  %v461_v11 = vmul.f32 %v1315_v1, %v203_v6  ;;  %v208_v16 = vld [vmem:[%s1308_s28 + $0x140] sm:$0xff] }
  0x3b   : > { %689 = vst [vmem:[%s1327_s21 + $0x38] sm:$0xff] %v433_v18  ;;  %v462_v13 = vmul.f32 %v1315_v1, %v204_v8  ;;  %v463_v15 = vmul.f32 %v1315_v1, %v205_v10  ;;  %v464_v17 = vmul.f32 %v1315_v1, %v206_v12  ;;  %v209_v18 = vld [vmem:[%s1308_s28 + $0x148] sm:$0xff]  ;;  %v465_v19 = vmul.f32 %v1315_v1, %v207_v14 }
  0x3c   : > { %690 = vst [vmem:[%s1327_s21 + $0x40] sm:$0xff] %v434_v20  ;;  %v210_v20 = vld [vmem:[%s1308_s28 + $0x150] sm:$0xff]  ;;  %v466_v21 = vmul.f32 %v1315_v1, %v208_v16  ;;  %v467_v23 = vmul.f32 %v1315_v1, %v209_v18 }
  0x3d   : > { %691 = vst [vmem:[%s1327_s21 + $0x48] sm:$0xff] %v435_v22  ;;  %v211_v22 = vld [vmem:[%s1308_s28 + $0x158] sm:$0xff]  ;;  %v468_v25 = vmul.f32 %v1315_v1, %v210_v20 }
  0x3e   : > { %692 = vst [vmem:[%s1327_s21 + $0x50] sm:$0xff] %v436_v24  ;;  %v212_v24 = vld [vmem:[%s1308_s28 + $0x160] sm:$0xff]  ;;  %v469_v27 = vmul.f32 %v1315_v1, %v211_v22 }
  0x3f   : > { %693 = vst [vmem:[%s1327_s21 + $0x58] sm:$0xff] %v437_v26  ;;  %v213_v26 = vld [vmem:[%s1308_s28 + $0x168] sm:$0xff]  ;;  %v470_v29 = vmul.f32 %v1315_v1, %v212_v24 }
  0x40   : > { %694 = vst [vmem:[%s1327_s21 + $0x60] sm:$0xff] %v438_v28  ;;  %v214_v28 = vld [vmem:[%s1308_s28 + $0x170] sm:$0xff]  ;;  %v471_v31 = vmul.f32 %v1315_v1, %v213_v26 }
  0x41   : > { %695 = vst [vmem:[%s1327_s21 + $0x68] sm:$0xff] %v439_v30  ;;  %v215_v30 = vld [vmem:[%s1308_s28 + $0x178] sm:$0xff]  ;;  %v472_v33 = vmul.f32 %v1315_v1, %v214_v28 }
  0x42   : > { %696 = vst [vmem:[%s1327_s21 + $0x70] sm:$0xff] %v440_v32  ;;  %v216_v32 = vld [vmem:[%s1308_s28 + $0x180] sm:$0xff]  ;;  %v473_v35 = vmul.f32 %v1315_v1, %v215_v30 }
  0x43   : > { %697 = vst [vmem:[%s1327_s21 + $0x78] sm:$0xff] %v441_v34  ;;  %v217_v34 = vld [vmem:[%s1308_s28 + $0x188] sm:$0xff]  ;;  %v474_v37 = vmul.f32 %v1315_v1, %v216_v32 }
  0x44   : > { %698 = vst [vmem:[%s1327_s21 + $0x80] sm:$0xff] %v442_v36  ;;  %v218_v36 = vld [vmem:[%s1308_s28 + $0x190] sm:$0xff]  ;;  %v475_v39 = vmul.f32 %v1315_v1, %v217_v34 }
  0x45   : > { %699 = vst [vmem:[%s1327_s21 + $0x88] sm:$0xff] %v443_v38  ;;  %v219_v38 = vld [vmem:[%s1308_s28 + $0x198] sm:$0xff]  ;;  %v476_v41 = vmul.f32 %v1315_v1, %v218_v36 }
  0x46   : > { %700 = vst [vmem:[%s1327_s21 + $0x90] sm:$0xff] %v444_v40  ;;  %v220_v40 = vld [vmem:[%s1308_s28 + $0x1a0] sm:$0xff]  ;;  %v477_v43 = vmul.f32 %v1315_v1, %v219_v38 }
  0x47   : > { %701 = vst [vmem:[%s1327_s21 + $0x98] sm:$0xff] %v445_v42  ;;  %v221_v42 = vld [vmem:[%s1308_s28 + $0x1a8] sm:$0xff]  ;;  %v478_v45 = vmul.f32 %v1315_v1, %v220_v40 }
  0x48   : > { %702 = vst [vmem:[%s1327_s21 + $0xa0] sm:$0xff] %v446_v44  ;;  %v222_v44 = vld [vmem:[%s1308_s28 + $0x1b0] sm:$0xff]  ;;  %v479_v47 = vmul.f32 %v1315_v1, %v221_v42 }
  0x49   : > { %703 = vst [vmem:[%s1327_s21 + $0xa8] sm:$0xff] %v447_v46  ;;  %v223_v46 = vld [vmem:[%s1308_s28 + $0x1b8] sm:$0xff]  ;;  %v480_v49 = vmul.f32 %v1315_v1, %v222_v44 }
  0x4a   : > { %704 = vst [vmem:[%s1327_s21 + $0xb0] sm:$0xff] %v448_v48  ;;  %v224_v48 = vld [vmem:[%s1308_s28 + $0x1c0] sm:$0xff]  ;;  %v481_v51 = vmul.f32 %v1315_v1, %v223_v46 }
  0x4b   : > { %705 = vst [vmem:[%s1327_s21 + $0xb8] sm:$0xff] %v449_v50  ;;  %v225_v50 = vld [vmem:[%s1308_s28 + $0x1c8] sm:$0xff]  ;;  %v482_v53 = vmul.f32 %v1315_v1, %v224_v48 }
  0x4c   : > { %706 = vst [vmem:[%s1327_s21 + $0xc0] sm:$0xff] %v450_v52  ;;  %v226_v52 = vld [vmem:[%s1308_s28 + $0x1d0] sm:$0xff]  ;;  %v483_v55 = vmul.f32 %v1315_v1, %v225_v50 }
  0x4d   : > { %707 = vst [vmem:[%s1327_s21 + $0xc8] sm:$0xff] %v451_v54  ;;  %v227_v54 = vld [vmem:[%s1308_s28 + $0x1d8] sm:$0xff]  ;;  %v484_v57 = vmul.f32 %v1315_v1, %v226_v52 }
  0x4e   : > { %708 = vst [vmem:[%s1327_s21 + $0xd0] sm:$0xff] %v452_v56  ;;  %v228_v56 = vld [vmem:[%s1308_s28 + $0x1e0] sm:$0xff]  ;;  %v485_v59 = vmul.f32 %v1315_v1, %v227_v54 }
  0x4f   : > { %709 = vst [vmem:[%s1327_s21 + $0xd8] sm:$0xff] %v453_v58  ;;  %v229_v58 = vld [vmem:[%s1308_s28 + $0x1e8] sm:$0xff]  ;;  %v486_v61 = vmul.f32 %v1315_v1, %v228_v56 }
  0x50   : > { %710 = vst [vmem:[%s1327_s21 + $0xe0] sm:$0xff] %v454_v60  ;;  %v230_v60 = vld [vmem:[%s1308_s28 + $0x1f0] sm:$0xff]  ;;  %v487_v63 = vmul.f32 %v1315_v1, %v229_v58 }
  0x51   : > { %711 = vst [vmem:[%s1327_s21 + $0xe8] sm:$0xff] %v455_v62  ;;  %v231_v62 = vld [vmem:[%s1308_s28 + $0x1f8] sm:$0xff]  ;;  %v488_v2 = vmul.f32 %v1315_v1, %v230_v60 }
  0x52   : > { %712 = vst [vmem:[%s1327_s21 + $0xf0] sm:$0xff] %v456_v0  ;;  %v232_v0 = vld [vmem:[%s1308_s28 + $0x200] sm:$0xff]  ;;  %v489_v4 = vmul.f32 %v1315_v1, %v231_v62 }
  0x53   : > { %713 = vst [vmem:[%s1327_s21 + $0xf8] sm:$0xff] %v457_v3  ;;  %v233_v3 = vld [vmem:[%s1308_s28 + $0x208] sm:$0xff]  ;;  %v490_v6 = vmul.f32 %v1315_v1, %v232_v0 }
  0x54   : > { %714 = vst [vmem:[%s1327_s21 + $0x100] sm:$0xff] %v458_v5  ;;  %v234_v5 = vld [vmem:[%s1308_s28 + $0x210] sm:$0xff]  ;;  %v491_v8 = vmul.f32 %v1315_v1, %v233_v3 }
  0x55   : > { %715 = vst [vmem:[%s1327_s21 + $0x108] sm:$0xff] %v459_v7  ;;  %v235_v7 = vld [vmem:[%s1308_s28 + $0x218] sm:$0xff]  ;;  %v492_v10 = vmul.f32 %v1315_v1, %v234_v5 }
  0x56   : > { %716 = vst [vmem:[%s1327_s21 + $0x110] sm:$0xff] %v460_v9  ;;  %v236_v9 = vld [vmem:[%s1308_s28 + $0x220] sm:$0xff]  ;;  %v493_v12 = vmul.f32 %v1315_v1, %v235_v7 }
  0x57   : > { %717 = vst [vmem:[%s1327_s21 + $0x118] sm:$0xff] %v461_v11  ;;  %v237_v11 = vld [vmem:[%s1308_s28 + $0x228] sm:$0xff]  ;;  %v494_v14 = vmul.f32 %v1315_v1, %v236_v9 }
  0x58   : > { %718 = vst [vmem:[%s1327_s21 + $0x120] sm:$0xff] %v462_v13  ;;  %v238_v13 = vld [vmem:[%s1308_s28 + $0x230] sm:$0xff]  ;;  %v495_v16 = vmul.f32 %v1315_v1, %v237_v11 }
  0x59   : > { %719 = vst [vmem:[%s1327_s21 + $0x128] sm:$0xff] %v463_v15  ;;  %v239_v15 = vld [vmem:[%s1308_s28 + $0x238] sm:$0xff]  ;;  %v496_v18 = vmul.f32 %v1315_v1, %v238_v13 }
  0x5a   : > { %720 = vst [vmem:[%s1327_s21 + $0x130] sm:$0xff] %v464_v17  ;;  %v240_v17 = vld [vmem:[%s1308_s28 + $0x240] sm:$0xff]  ;;  %v497_v20 = vmul.f32 %v1315_v1, %v239_v15 }
  0x5b   : > { %721 = vst [vmem:[%s1327_s21 + $0x138] sm:$0xff] %v465_v19  ;;  %v241_v19 = vld [vmem:[%s1308_s28 + $0x248] sm:$0xff]  ;;  %v498_v22 = vmul.f32 %v1315_v1, %v240_v17 }
  0x5c   : > { %722 = vst [vmem:[%s1327_s21 + $0x140] sm:$0xff] %v466_v21  ;;  %v242_v21 = vld [vmem:[%s1308_s28 + $0x250] sm:$0xff]  ;;  %v499_v24 = vmul.f32 %v1315_v1, %v241_v19 }
  0x5d   : > { %723 = vst [vmem:[%s1327_s21 + $0x148] sm:$0xff] %v467_v23  ;;  %v243_v23 = vld [vmem:[%s1308_s28 + $0x258] sm:$0xff]  ;;  %v500_v26 = vmul.f32 %v1315_v1, %v242_v21 }
  0x5e   : > { %724 = vst [vmem:[%s1327_s21 + $0x150] sm:$0xff] %v468_v25  ;;  %v244_v25 = vld [vmem:[%s1308_s28 + $0x260] sm:$0xff]  ;;  %v501_v28 = vmul.f32 %v1315_v1, %v243_v23 }
  0x5f   : > { %725 = vst [vmem:[%s1327_s21 + $0x158] sm:$0xff] %v469_v27  ;;  %v245_v27 = vld [vmem:[%s1308_s28 + $0x268] sm:$0xff]  ;;  %v502_v30 = vmul.f32 %v1315_v1, %v244_v25 }
  0x60   : > { %726 = vst [vmem:[%s1327_s21 + $0x160] sm:$0xff] %v470_v29  ;;  %v246_v29 = vld [vmem:[%s1308_s28 + $0x270] sm:$0xff]  ;;  %v503_v32 = vmul.f32 %v1315_v1, %v245_v27 }
  0x61   : > { %727 = vst [vmem:[%s1327_s21 + $0x168] sm:$0xff] %v471_v31  ;;  %v247_v31 = vld [vmem:[%s1308_s28 + $0x278] sm:$0xff]  ;;  %v504_v34 = vmul.f32 %v1315_v1, %v246_v29 }
  0x62   : > { %728 = vst [vmem:[%s1327_s21 + $0x170] sm:$0xff] %v472_v33  ;;  %v248_v33 = vld [vmem:[%s1308_s28 + $0x280] sm:$0xff]  ;;  %v505_v36 = vmul.f32 %v1315_v1, %v247_v31 }
  0x63   : > { %729 = vst [vmem:[%s1327_s21 + $0x178] sm:$0xff] %v473_v35  ;;  %v249_v35 = vld [vmem:[%s1308_s28 + $0x288] sm:$0xff]  ;;  %v506_v38 = vmul.f32 %v1315_v1, %v248_v33 }
  0x64   : > { %730 = vst [vmem:[%s1327_s21 + $0x180] sm:$0xff] %v474_v37  ;;  %v250_v37 = vld [vmem:[%s1308_s28 + $0x290] sm:$0xff]  ;;  %v507_v40 = vmul.f32 %v1315_v1, %v249_v35 }
  0x65   : > { %731 = vst [vmem:[%s1327_s21 + $0x188] sm:$0xff] %v475_v39  ;;  %v251_v39 = vld [vmem:[%s1308_s28 + $0x298] sm:$0xff]  ;;  %v508_v42 = vmul.f32 %v1315_v1, %v250_v37 }
  0x66   : > { %732 = vst [vmem:[%s1327_s21 + $0x190] sm:$0xff] %v476_v41  ;;  %v252_v41 = vld [vmem:[%s1308_s28 + $0x2a0] sm:$0xff]  ;;  %v509_v44 = vmul.f32 %v1315_v1, %v251_v39 }
  0x67   : > { %733 = vst [vmem:[%s1327_s21 + $0x198] sm:$0xff] %v477_v43  ;;  %v253_v43 = vld [vmem:[%s1308_s28 + $0x2a8] sm:$0xff]  ;;  %v510_v46 = vmul.f32 %v1315_v1, %v252_v41 }
  0x68   : > { %734 = vst [vmem:[%s1327_s21 + $0x1a0] sm:$0xff] %v478_v45  ;;  %v254_v45 = vld [vmem:[%s1308_s28 + $0x2b0] sm:$0xff]  ;;  %v511_v48 = vmul.f32 %v1315_v1, %v253_v43 }
  0x69   : > { %735 = vst [vmem:[%s1327_s21 + $0x1a8] sm:$0xff] %v479_v47  ;;  %v255_v47 = vld [vmem:[%s1308_s28 + $0x2b8] sm:$0xff]  ;;  %v512_v50 = vmul.f32 %v1315_v1, %v254_v45 }
  0x6a   : > { %736 = vst [vmem:[%s1327_s21 + $0x1b0] sm:$0xff] %v480_v49  ;;  %v256_v49 = vld [vmem:[%s1308_s28 + $0x2c0] sm:$0xff]  ;;  %v513_v52 = vmul.f32 %v1315_v1, %v255_v47 }
  0x6b   : > { %737 = vst [vmem:[%s1327_s21 + $0x1b8] sm:$0xff] %v481_v51  ;;  %v257_v51 = vld [vmem:[%s1308_s28 + $0x2c8] sm:$0xff]  ;;  %v514_v54 = vmul.f32 %v1315_v1, %v256_v49 }
  0x6c   : > { %738 = vst [vmem:[%s1327_s21 + $0x1c0] sm:$0xff] %v482_v53  ;;  %v258_v53 = vld [vmem:[%s1308_s28 + $0x2d0] sm:$0xff]  ;;  %v515_v56 = vmul.f32 %v1315_v1, %v257_v51 }
  0x6d   : > { %739 = vst [vmem:[%s1327_s21 + $0x1c8] sm:$0xff] %v483_v55  ;;  %v259_v55 = vld [vmem:[%s1308_s28 + $0x2d8] sm:$0xff]  ;;  %v516_v58 = vmul.f32 %v1315_v1, %v258_v53 }
  0x6e   : > { %740 = vst [vmem:[%s1327_s21 + $0x1d0] sm:$0xff] %v484_v57  ;;  %v260_v57 = vld [vmem:[%s1308_s28 + $0x2e0] sm:$0xff]  ;;  %v517_v60 = vmul.f32 %v1315_v1, %v259_v55 }
  0x6f   : > { %741 = vst [vmem:[%s1327_s21 + $0x1d8] sm:$0xff] %v485_v59  ;;  %v261_v59 = vld [vmem:[%s1308_s28 + $0x2e8] sm:$0xff]  ;;  %v518_v62 = vmul.f32 %v1315_v1, %v260_v57 }
  0x70   : > { %742 = vst [vmem:[%s1327_s21 + $0x1e0] sm:$0xff] %v486_v61  ;;  %v262_v61 = vld [vmem:[%s1308_s28 + $0x2f0] sm:$0xff]  ;;  %v519_v0 = vmul.f32 %v1315_v1, %v261_v59 }
  0x71   : > { %743 = vst [vmem:[%s1327_s21 + $0x1e8] sm:$0xff] %v487_v63  ;;  %v263_v63 = vld [vmem:[%s1308_s28 + $0x2f8] sm:$0xff]  ;;  %v520_v3 = vmul.f32 %v1315_v1, %v262_v61 }
  0x72   : > { %744 = vst [vmem:[%s1327_s21 + $0x1f0] sm:$0xff] %v488_v2  ;;  %v264_v2 = vld [vmem:[%s1308_s28 + $0x300] sm:$0xff]  ;;  %v521_v5 = vmul.f32 %v1315_v1, %v263_v63 }
  0x73   : > { %745 = vst [vmem:[%s1327_s21 + $0x1f8] sm:$0xff] %v489_v4  ;;  %v265_v4 = vld [vmem:[%s1308_s28 + $0x308] sm:$0xff]  ;;  %v522_v7 = vmul.f32 %v1315_v1, %v264_v2 }
  0x74   : > { %746 = vst [vmem:[%s1327_s21 + $0x200] sm:$0xff] %v490_v6  ;;  %v266_v6 = vld [vmem:[%s1308_s28 + $0x310] sm:$0xff]  ;;  %v523_v9 = vmul.f32 %v1315_v1, %v265_v4 }
  0x75   : > { %747 = vst [vmem:[%s1327_s21 + $0x208] sm:$0xff] %v491_v8  ;;  %v267_v8 = vld [vmem:[%s1308_s28 + $0x318] sm:$0xff]  ;;  %v524_v11 = vmul.f32 %v1315_v1, %v266_v6 }
  0x76   : > { %748 = vst [vmem:[%s1327_s21 + $0x210] sm:$0xff] %v492_v10  ;;  %v268_v10 = vld [vmem:[%s1308_s28 + $0x320] sm:$0xff]  ;;  %v525_v13 = vmul.f32 %v1315_v1, %v267_v8 }
  0x77   : > { %749 = vst [vmem:[%s1327_s21 + $0x218] sm:$0xff] %v493_v12  ;;  %v269_v12 = vld [vmem:[%s1308_s28 + $0x328] sm:$0xff]  ;;  %v526_v15 = vmul.f32 %v1315_v1, %v268_v10 }
  0x78   : > { %750 = vst [vmem:[%s1327_s21 + $0x220] sm:$0xff] %v494_v14  ;;  %v270_v14 = vld [vmem:[%s1308_s28 + $0x330] sm:$0xff]  ;;  %v527_v17 = vmul.f32 %v1315_v1, %v269_v12 }
  0x79   : > { %751 = vst [vmem:[%s1327_s21 + $0x228] sm:$0xff] %v495_v16  ;;  %v271_v16 = vld [vmem:[%s1308_s28 + $0x338] sm:$0xff]  ;;  %v528_v19 = vmul.f32 %v1315_v1, %v270_v14 }
  0x7a   : > { %752 = vst [vmem:[%s1327_s21 + $0x230] sm:$0xff] %v496_v18  ;;  %v272_v18 = vld [vmem:[%s1308_s28 + $0x340] sm:$0xff]  ;;  %v529_v21 = vmul.f32 %v1315_v1, %v271_v16 }
  0x7b   : > { %753 = vst [vmem:[%s1327_s21 + $0x238] sm:$0xff] %v497_v20  ;;  %v273_v20 = vld [vmem:[%s1308_s28 + $0x348] sm:$0xff]  ;;  %v530_v23 = vmul.f32 %v1315_v1, %v272_v18 }
  0x7c   : > { %754 = vst [vmem:[%s1327_s21 + $0x240] sm:$0xff] %v498_v22  ;;  %v274_v22 = vld [vmem:[%s1308_s28 + $0x350] sm:$0xff]  ;;  %v531_v25 = vmul.f32 %v1315_v1, %v273_v20 }
  0x7d   : > { %755 = vst [vmem:[%s1327_s21 + $0x248] sm:$0xff] %v499_v24  ;;  %v275_v24 = vld [vmem:[%s1308_s28 + $0x358] sm:$0xff]  ;;  %v532_v27 = vmul.f32 %v1315_v1, %v274_v22 }
  0x7e   : > { %756 = vst [vmem:[%s1327_s21 + $0x250] sm:$0xff] %v500_v26  ;;  %v276_v26 = vld [vmem:[%s1308_s28 + $0x360] sm:$0xff]  ;;  %v533_v29 = vmul.f32 %v1315_v1, %v275_v24 }
  0x7f   : > { %757 = vst [vmem:[%s1327_s21 + $0x258] sm:$0xff] %v501_v28  ;;  %v277_v28 = vld [vmem:[%s1308_s28 + $0x368] sm:$0xff]  ;;  %v534_v31 = vmul.f32 %v1315_v1, %v276_v26 }
  0x80   : > { %758 = vst [vmem:[%s1327_s21 + $0x260] sm:$0xff] %v502_v30  ;;  %v278_v30 = vld [vmem:[%s1308_s28 + $0x370] sm:$0xff]  ;;  %v535_v33 = vmul.f32 %v1315_v1, %v277_v28 }
  0x81   : > { %759 = vst [vmem:[%s1327_s21 + $0x268] sm:$0xff] %v503_v32  ;;  %v279_v32 = vld [vmem:[%s1308_s28 + $0x378] sm:$0xff]  ;;  %v536_v35 = vmul.f32 %v1315_v1, %v278_v30 }
  0x82   : > { %760 = vst [vmem:[%s1327_s21 + $0x270] sm:$0xff] %v504_v34  ;;  %v280_v34 = vld [vmem:[%s1308_s28 + $0x380] sm:$0xff]  ;;  %v537_v37 = vmul.f32 %v1315_v1, %v279_v32 }
  0x83   : > { %761 = vst [vmem:[%s1327_s21 + $0x278] sm:$0xff] %v505_v36  ;;  %v281_v36 = vld [vmem:[%s1308_s28 + $0x388] sm:$0xff]  ;;  %v538_v39 = vmul.f32 %v1315_v1, %v280_v34 }
  0x84   : > { %762 = vst [vmem:[%s1327_s21 + $0x280] sm:$0xff] %v506_v38  ;;  %v282_v38 = vld [vmem:[%s1308_s28 + $0x390] sm:$0xff]  ;;  %v539_v41 = vmul.f32 %v1315_v1, %v281_v36 }
  0x85   : > { %763 = vst [vmem:[%s1327_s21 + $0x288] sm:$0xff] %v507_v40  ;;  %v283_v40 = vld [vmem:[%s1308_s28 + $0x398] sm:$0xff]  ;;  %v540_v43 = vmul.f32 %v1315_v1, %v282_v38 }
  0x86   : > { %764 = vst [vmem:[%s1327_s21 + $0x290] sm:$0xff] %v508_v42  ;;  %v284_v42 = vld [vmem:[%s1308_s28 + $0x3a0] sm:$0xff]  ;;  %v541_v45 = vmul.f32 %v1315_v1, %v283_v40 }
  0x87   : > { %765 = vst [vmem:[%s1327_s21 + $0x298] sm:$0xff] %v509_v44  ;;  %v285_v44 = vld [vmem:[%s1308_s28 + $0x3a8] sm:$0xff]  ;;  %v542_v47 = vmul.f32 %v1315_v1, %v284_v42 }
  0x88   : > { %766 = vst [vmem:[%s1327_s21 + $0x2a0] sm:$0xff] %v510_v46  ;;  %v286_v46 = vld [vmem:[%s1308_s28 + $0x3b0] sm:$0xff]  ;;  %v543_v49 = vmul.f32 %v1315_v1, %v285_v44 }
  0x89   : > { %767 = vst [vmem:[%s1327_s21 + $0x2a8] sm:$0xff] %v511_v48  ;;  %v287_v48 = vld [vmem:[%s1308_s28 + $0x3b8] sm:$0xff]  ;;  %v544_v51 = vmul.f32 %v1315_v1, %v286_v46 }
  0x8a   : > { %768 = vst [vmem:[%s1327_s21 + $0x2b0] sm:$0xff] %v512_v50  ;;  %v288_v50 = vld [vmem:[%s1308_s28 + $0x3c0] sm:$0xff]  ;;  %v545_v53 = vmul.f32 %v1315_v1, %v287_v48 }
  0x8b   : > { %769 = vst [vmem:[%s1327_s21 + $0x2b8] sm:$0xff] %v513_v52  ;;  %v289_v52 = vld [vmem:[%s1308_s28 + $0x3c8] sm:$0xff]  ;;  %v546_v55 = vmul.f32 %v1315_v1, %v288_v50 }
  0x8c   : > { %770 = vst [vmem:[%s1327_s21 + $0x2c0] sm:$0xff] %v514_v54  ;;  %v290_v54 = vld [vmem:[%s1308_s28 + $0x3d0] sm:$0xff]  ;;  %v547_v57 = vmul.f32 %v1315_v1, %v289_v52 }
  0x8d   : > { %771 = vst [vmem:[%s1327_s21 + $0x2c8] sm:$0xff] %v515_v56  ;;  %v291_v56 = vld [vmem:[%s1308_s28 + $0x3d8] sm:$0xff]  ;;  %v548_v59 = vmul.f32 %v1315_v1, %v290_v54 }
  0x8e   : > { %772 = vst [vmem:[%s1327_s21 + $0x2d0] sm:$0xff] %v516_v58  ;;  %v292_v58 = vld [vmem:[%s1308_s28 + $0x3e0] sm:$0xff]  ;;  %v549_v61 = vmul.f32 %v1315_v1, %v291_v56 }
  0x8f   : > { %773 = vst [vmem:[%s1327_s21 + $0x2d8] sm:$0xff] %v517_v60  ;;  %v293_v60 = vld [vmem:[%s1308_s28 + $0x3e8] sm:$0xff]  ;;  %v550_v63 = vmul.f32 %v1315_v1, %v292_v58 }
  0x90   : > { %774 = vst [vmem:[%s1327_s21 + $0x2e0] sm:$0xff] %v518_v62  ;;  %v294_v62 = vld [vmem:[%s1308_s28 + $0x3f0] sm:$0xff]  ;;  %v551_v2 = vmul.f32 %v1315_v1, %v293_v60 }
  0x91   : > { %775 = vst [vmem:[%s1327_s21 + $0x2e8] sm:$0xff] %v519_v0  ;;  %v295_v0 = vld [vmem:[%s1308_s28 + $0x3f8] sm:$0xff]  ;;  %v552_v4 = vmul.f32 %v1315_v1, %v294_v62 }
  0x92   : > { %776 = vst [vmem:[%s1327_s21 + $0x2f0] sm:$0xff] %v520_v3  ;;  %v296_v3 = vld [vmem:[%s1308_s28 + $0x400] sm:$0xff]  ;;  %v553_v6 = vmul.f32 %v1315_v1, %v295_v0 }
  0x93   : > { %777 = vst [vmem:[%s1327_s21 + $0x2f8] sm:$0xff] %v521_v5  ;;  %v297_v5 = vld [vmem:[%s1308_s28 + $0x408] sm:$0xff]  ;;  %v554_v8 = vmul.f32 %v1315_v1, %v296_v3 }
  0x94   : > { %778 = vst [vmem:[%s1327_s21 + $0x300] sm:$0xff] %v522_v7  ;;  %v298_v7 = vld [vmem:[%s1308_s28 + $0x410] sm:$0xff]  ;;  %v555_v10 = vmul.f32 %v1315_v1, %v297_v5 }
  0x95   : > { %779 = vst [vmem:[%s1327_s21 + $0x308] sm:$0xff] %v523_v9  ;;  %v299_v9 = vld [vmem:[%s1308_s28 + $0x418] sm:$0xff]  ;;  %v556_v12 = vmul.f32 %v1315_v1, %v298_v7 }
  0x96   : > { %780 = vst [vmem:[%s1327_s21 + $0x310] sm:$0xff] %v524_v11  ;;  %v300_v11 = vld [vmem:[%s1308_s28 + $0x420] sm:$0xff]  ;;  %v557_v14 = vmul.f32 %v1315_v1, %v299_v9 }
  0x97   : > { %781 = vst [vmem:[%s1327_s21 + $0x318] sm:$0xff] %v525_v13  ;;  %v301_v13 = vld [vmem:[%s1308_s28 + $0x428] sm:$0xff]  ;;  %v558_v16 = vmul.f32 %v1315_v1, %v300_v11 }
  0x98   : > { %782 = vst [vmem:[%s1327_s21 + $0x320] sm:$0xff] %v526_v15  ;;  %v302_v15 = vld [vmem:[%s1308_s28 + $0x430] sm:$0xff]  ;;  %v559_v18 = vmul.f32 %v1315_v1, %v301_v13 }
  0x99   : > { %783 = vst [vmem:[%s1327_s21 + $0x328] sm:$0xff] %v527_v17  ;;  %v303_v17 = vld [vmem:[%s1308_s28 + $0x438] sm:$0xff]  ;;  %v560_v20 = vmul.f32 %v1315_v1, %v302_v15 }
  0x9a   : > { %784 = vst [vmem:[%s1327_s21 + $0x330] sm:$0xff] %v528_v19  ;;  %v304_v19 = vld [vmem:[%s1308_s28 + $0x440] sm:$0xff]  ;;  %v561_v22 = vmul.f32 %v1315_v1, %v303_v17 }
  0x9b   : > { %785 = vst [vmem:[%s1327_s21 + $0x338] sm:$0xff] %v529_v21  ;;  %v305_v21 = vld [vmem:[%s1308_s28 + $0x448] sm:$0xff]  ;;  %v562_v24 = vmul.f32 %v1315_v1, %v304_v19 }
  0x9c   : > { %786 = vst [vmem:[%s1327_s21 + $0x340] sm:$0xff] %v530_v23  ;;  %v306_v23 = vld [vmem:[%s1308_s28 + $0x450] sm:$0xff]  ;;  %v563_v26 = vmul.f32 %v1315_v1, %v305_v21 }
  0x9d   : > { %787 = vst [vmem:[%s1327_s21 + $0x348] sm:$0xff] %v531_v25  ;;  %v307_v25 = vld [vmem:[%s1308_s28 + $0x458] sm:$0xff]  ;;  %v564_v28 = vmul.f32 %v1315_v1, %v306_v23 }
  0x9e   : > { %788 = vst [vmem:[%s1327_s21 + $0x350] sm:$0xff] %v532_v27  ;;  %v308_v27 = vld [vmem:[%s1308_s28 + $0x460] sm:$0xff]  ;;  %v565_v30 = vmul.f32 %v1315_v1, %v307_v25 }
  0x9f   : > { %789 = vst [vmem:[%s1327_s21 + $0x358] sm:$0xff] %v533_v29  ;;  %v309_v29 = vld [vmem:[%s1308_s28 + $0x468] sm:$0xff]  ;;  %v566_v32 = vmul.f32 %v1315_v1, %v308_v27 }
  0xa0   : > { %790 = vst [vmem:[%s1327_s21 + $0x360] sm:$0xff] %v534_v31  ;;  %v310_v31 = vld [vmem:[%s1308_s28 + $0x470] sm:$0xff]  ;;  %v567_v34 = vmul.f32 %v1315_v1, %v309_v29 }
  0xa1   : > { %791 = vst [vmem:[%s1327_s21 + $0x368] sm:$0xff] %v535_v33  ;;  %v311_v33 = vld [vmem:[%s1308_s28 + $0x478] sm:$0xff]  ;;  %v568_v36 = vmul.f32 %v1315_v1, %v310_v31 }
  0xa2   : > { %792 = vst [vmem:[%s1327_s21 + $0x370] sm:$0xff] %v536_v35  ;;  %v312_v35 = vld [vmem:[%s1308_s28 + $0x480] sm:$0xff]  ;;  %v569_v38 = vmul.f32 %v1315_v1, %v311_v33 }
  0xa3   : > { %793 = vst [vmem:[%s1327_s21 + $0x378] sm:$0xff] %v537_v37  ;;  %v313_v37 = vld [vmem:[%s1308_s28 + $0x488] sm:$0xff]  ;;  %v570_v40 = vmul.f32 %v1315_v1, %v312_v35 }
  0xa4   : > { %794 = vst [vmem:[%s1327_s21 + $0x380] sm:$0xff] %v538_v39  ;;  %v314_v39 = vld [vmem:[%s1308_s28 + $0x490] sm:$0xff]  ;;  %v571_v42 = vmul.f32 %v1315_v1, %v313_v37 }
  0xa5   : > { %795 = vst [vmem:[%s1327_s21 + $0x388] sm:$0xff] %v539_v41  ;;  %v315_v41 = vld [vmem:[%s1308_s28 + $0x498] sm:$0xff]  ;;  %v572_v44 = vmul.f32 %v1315_v1, %v314_v39 }
  0xa6   : > { %796 = vst [vmem:[%s1327_s21 + $0x390] sm:$0xff] %v540_v43  ;;  %v316_v43 = vld [vmem:[%s1308_s28 + $0x4a0] sm:$0xff]  ;;  %v573_v46 = vmul.f32 %v1315_v1, %v315_v41 }
  0xa7   : > { %797 = vst [vmem:[%s1327_s21 + $0x398] sm:$0xff] %v541_v45  ;;  %v317_v45 = vld [vmem:[%s1308_s28 + $0x4a8] sm:$0xff]  ;;  %v574_v48 = vmul.f32 %v1315_v1, %v316_v43 }
  0xa8   : > { %798 = vst [vmem:[%s1327_s21 + $0x3a0] sm:$0xff] %v542_v47  ;;  %v318_v47 = vld [vmem:[%s1308_s28 + $0x4b0] sm:$0xff]  ;;  %v575_v50 = vmul.f32 %v1315_v1, %v317_v45 }
  0xa9   : > { %799 = vst [vmem:[%s1327_s21 + $0x3a8] sm:$0xff] %v543_v49  ;;  %v319_v49 = vld [vmem:[%s1308_s28 + $0x4b8] sm:$0xff]  ;;  %v576_v52 = vmul.f32 %v1315_v1, %v318_v47 }
  0xaa   : > { %800 = vst [vmem:[%s1327_s21 + $0x3b0] sm:$0xff] %v544_v51  ;;  %v320_v51 = vld [vmem:[%s1308_s28 + $0x4c0] sm:$0xff]  ;;  %v577_v54 = vmul.f32 %v1315_v1, %v319_v49 }
  0xab   : > { %801 = vst [vmem:[%s1327_s21 + $0x3b8] sm:$0xff] %v545_v53  ;;  %v321_v53 = vld [vmem:[%s1308_s28 + $0x4c8] sm:$0xff]  ;;  %v578_v56 = vmul.f32 %v1315_v1, %v320_v51 }
  0xac   : > { %802 = vst [vmem:[%s1327_s21 + $0x3c0] sm:$0xff] %v546_v55  ;;  %v322_v55 = vld [vmem:[%s1308_s28 + $0x4d0] sm:$0xff]  ;;  %v579_v58 = vmul.f32 %v1315_v1, %v321_v53 }
  0xad   : > { %803 = vst [vmem:[%s1327_s21 + $0x3c8] sm:$0xff] %v547_v57  ;;  %v323_v57 = vld [vmem:[%s1308_s28 + $0x4d8] sm:$0xff]  ;;  %v580_v60 = vmul.f32 %v1315_v1, %v322_v55 }
  0xae   : > { %804 = vst [vmem:[%s1327_s21 + $0x3d0] sm:$0xff] %v548_v59  ;;  %v324_v59 = vld [vmem:[%s1308_s28 + $0x4e0] sm:$0xff]  ;;  %v581_v62 = vmul.f32 %v1315_v1, %v323_v57 }
  0xaf   : > { %805 = vst [vmem:[%s1327_s21 + $0x3d8] sm:$0xff] %v549_v61  ;;  %v325_v61 = vld [vmem:[%s1308_s28 + $0x4e8] sm:$0xff]  ;;  %v582_v0 = vmul.f32 %v1315_v1, %v324_v59 }
  0xb0   : > { %806 = vst [vmem:[%s1327_s21 + $0x3e0] sm:$0xff] %v550_v63  ;;  %v326_v63 = vld [vmem:[%s1308_s28 + $0x4f0] sm:$0xff]  ;;  %v583_v3 = vmul.f32 %v1315_v1, %v325_v61 }
  0xb1   : > { %807 = vst [vmem:[%s1327_s21 + $0x3e8] sm:$0xff] %v551_v2  ;;  %v327_v2 = vld [vmem:[%s1308_s28 + $0x4f8] sm:$0xff]  ;;  %v584_v5 = vmul.f32 %v1315_v1, %v326_v63 }
  0xb2   : > { %808 = vst [vmem:[%s1327_s21 + $0x3f0] sm:$0xff] %v552_v4  ;;  %v328_v4 = vld [vmem:[%s1308_s28 + $0x500] sm:$0xff]  ;;  %v585_v7 = vmul.f32 %v1315_v1, %v327_v2 }
  0xb3   : > { %809 = vst [vmem:[%s1327_s21 + $0x3f8] sm:$0xff] %v553_v6  ;;  %v329_v6 = vld [vmem:[%s1308_s28 + $0x508] sm:$0xff]  ;;  %v586_v9 = vmul.f32 %v1315_v1, %v328_v4 }
  0xb4   : > { %810 = vst [vmem:[%s1327_s21 + $0x400] sm:$0xff] %v554_v8  ;;  %v330_v8 = vld [vmem:[%s1308_s28 + $0x510] sm:$0xff]  ;;  %v587_v11 = vmul.f32 %v1315_v1, %v329_v6 }
  0xb5   : > { %811 = vst [vmem:[%s1327_s21 + $0x408] sm:$0xff] %v555_v10  ;;  %v331_v10 = vld [vmem:[%s1308_s28 + $0x518] sm:$0xff]  ;;  %v588_v13 = vmul.f32 %v1315_v1, %v330_v8 }
  0xb6   : > { %812 = vst [vmem:[%s1327_s21 + $0x410] sm:$0xff] %v556_v12  ;;  %v332_v12 = vld [vmem:[%s1308_s28 + $0x520] sm:$0xff]  ;;  %v589_v15 = vmul.f32 %v1315_v1, %v331_v10 }
  0xb7   : > { %813 = vst [vmem:[%s1327_s21 + $0x418] sm:$0xff] %v557_v14  ;;  %v333_v14 = vld [vmem:[%s1308_s28 + $0x528] sm:$0xff]  ;;  %v590_v17 = vmul.f32 %v1315_v1, %v332_v12 }
  0xb8   : > { %814 = vst [vmem:[%s1327_s21 + $0x420] sm:$0xff] %v558_v16  ;;  %v334_v16 = vld [vmem:[%s1308_s28 + $0x530] sm:$0xff]  ;;  %v591_v19 = vmul.f32 %v1315_v1, %v333_v14 }
  0xb9   : > { %815 = vst [vmem:[%s1327_s21 + $0x428] sm:$0xff] %v559_v18  ;;  %v335_v18 = vld [vmem:[%s1308_s28 + $0x538] sm:$0xff]  ;;  %v592_v21 = vmul.f32 %v1315_v1, %v334_v16 }
  0xba   : > { %816 = vst [vmem:[%s1327_s21 + $0x430] sm:$0xff] %v560_v20  ;;  %v336_v20 = vld [vmem:[%s1308_s28 + $0x540] sm:$0xff]  ;;  %v593_v23 = vmul.f32 %v1315_v1, %v335_v18 }
  0xbb   : > { %817 = vst [vmem:[%s1327_s21 + $0x438] sm:$0xff] %v561_v22  ;;  %v337_v22 = vld [vmem:[%s1308_s28 + $0x548] sm:$0xff]  ;;  %v594_v25 = vmul.f32 %v1315_v1, %v336_v20 }
  0xbc   : > { %818 = vst [vmem:[%s1327_s21 + $0x440] sm:$0xff] %v562_v24  ;;  %v338_v24 = vld [vmem:[%s1308_s28 + $0x550] sm:$0xff]  ;;  %v595_v27 = vmul.f32 %v1315_v1, %v337_v22 }
  0xbd   : > { %819 = vst [vmem:[%s1327_s21 + $0x448] sm:$0xff] %v563_v26  ;;  %v339_v26 = vld [vmem:[%s1308_s28 + $0x558] sm:$0xff]  ;;  %v596_v29 = vmul.f32 %v1315_v1, %v338_v24 }
  0xbe   : > { %820 = vst [vmem:[%s1327_s21 + $0x450] sm:$0xff] %v564_v28  ;;  %v340_v28 = vld [vmem:[%s1308_s28 + $0x560] sm:$0xff]  ;;  %v597_v31 = vmul.f32 %v1315_v1, %v339_v26 }
  0xbf   : > { %821 = vst [vmem:[%s1327_s21 + $0x458] sm:$0xff] %v565_v30  ;;  %v341_v30 = vld [vmem:[%s1308_s28 + $0x568] sm:$0xff]  ;;  %v598_v33 = vmul.f32 %v1315_v1, %v340_v28 }
  0xc0   : > { %822 = vst [vmem:[%s1327_s21 + $0x460] sm:$0xff] %v566_v32  ;;  %v342_v32 = vld [vmem:[%s1308_s28 + $0x570] sm:$0xff]  ;;  %v599_v35 = vmul.f32 %v1315_v1, %v341_v30 }
  0xc1   : > { %823 = vst [vmem:[%s1327_s21 + $0x468] sm:$0xff] %v567_v34  ;;  %v343_v34 = vld [vmem:[%s1308_s28 + $0x578] sm:$0xff]  ;;  %v600_v37 = vmul.f32 %v1315_v1, %v342_v32 }
  0xc2   : > { %824 = vst [vmem:[%s1327_s21 + $0x470] sm:$0xff] %v568_v36  ;;  %v344_v36 = vld [vmem:[%s1308_s28 + $0x580] sm:$0xff]  ;;  %v601_v39 = vmul.f32 %v1315_v1, %v343_v34 }
  0xc3   : > { %825 = vst [vmem:[%s1327_s21 + $0x478] sm:$0xff] %v569_v38  ;;  %v345_v38 = vld [vmem:[%s1308_s28 + $0x588] sm:$0xff]  ;;  %v602_v41 = vmul.f32 %v1315_v1, %v344_v36 }
  0xc4   : > { %826 = vst [vmem:[%s1327_s21 + $0x480] sm:$0xff] %v570_v40  ;;  %v346_v40 = vld [vmem:[%s1308_s28 + $0x590] sm:$0xff]  ;;  %v603_v43 = vmul.f32 %v1315_v1, %v345_v38 }
  0xc5   : > { %827 = vst [vmem:[%s1327_s21 + $0x488] sm:$0xff] %v571_v42  ;;  %v347_v42 = vld [vmem:[%s1308_s28 + $0x598] sm:$0xff]  ;;  %v604_v45 = vmul.f32 %v1315_v1, %v346_v40 }
  0xc6   : > { %828 = vst [vmem:[%s1327_s21 + $0x490] sm:$0xff] %v572_v44  ;;  %v348_v44 = vld [vmem:[%s1308_s28 + $0x5a0] sm:$0xff]  ;;  %v605_v47 = vmul.f32 %v1315_v1, %v347_v42 }
  0xc7   : > { %829 = vst [vmem:[%s1327_s21 + $0x498] sm:$0xff] %v573_v46  ;;  %v349_v46 = vld [vmem:[%s1308_s28 + $0x5a8] sm:$0xff]  ;;  %v606_v49 = vmul.f32 %v1315_v1, %v348_v44 }
  0xc8   : > { %830 = vst [vmem:[%s1327_s21 + $0x4a0] sm:$0xff] %v574_v48  ;;  %v350_v48 = vld [vmem:[%s1308_s28 + $0x5b0] sm:$0xff]  ;;  %v607_v51 = vmul.f32 %v1315_v1, %v349_v46 }
  0xc9   : > { %831 = vst [vmem:[%s1327_s21 + $0x4a8] sm:$0xff] %v575_v50  ;;  %v351_v50 = vld [vmem:[%s1308_s28 + $0x5b8] sm:$0xff]  ;;  %v608_v53 = vmul.f32 %v1315_v1, %v350_v48 }
  0xca   : > { %832 = vst [vmem:[%s1327_s21 + $0x4b0] sm:$0xff] %v576_v52  ;;  %v352_v52 = vld [vmem:[%s1308_s28 + $0x5c0] sm:$0xff]  ;;  %v609_v55 = vmul.f32 %v1315_v1, %v351_v50 }
  0xcb   : > { %833 = vst [vmem:[%s1327_s21 + $0x4b8] sm:$0xff] %v577_v54  ;;  %v353_v54 = vld [vmem:[%s1308_s28 + $0x5c8] sm:$0xff]  ;;  %v610_v57 = vmul.f32 %v1315_v1, %v352_v52 }
  0xcc   : > { %834 = vst [vmem:[%s1327_s21 + $0x4c0] sm:$0xff] %v578_v56  ;;  %v354_v56 = vld [vmem:[%s1308_s28 + $0x5d0] sm:$0xff]  ;;  %v611_v59 = vmul.f32 %v1315_v1, %v353_v54 }
  0xcd   : > { %835 = vst [vmem:[%s1327_s21 + $0x4c8] sm:$0xff] %v579_v58  ;;  %v355_v58 = vld [vmem:[%s1308_s28 + $0x5d8] sm:$0xff]  ;;  %v612_v61 = vmul.f32 %v1315_v1, %v354_v56 }
  0xce   : > { %836 = vst [vmem:[%s1327_s21 + $0x4d0] sm:$0xff] %v580_v60  ;;  %v356_v60 = vld [vmem:[%s1308_s28 + $0x5e0] sm:$0xff]  ;;  %v613_v63 = vmul.f32 %v1315_v1, %v355_v58 }
  0xcf   : > { %837 = vst [vmem:[%s1327_s21 + $0x4d8] sm:$0xff] %v581_v62  ;;  %v357_v62 = vld [vmem:[%s1308_s28 + $0x5e8] sm:$0xff]  ;;  %v614_v2 = vmul.f32 %v1315_v1, %v356_v60 }
  0xd0   : > { %838 = vst [vmem:[%s1327_s21 + $0x4e0] sm:$0xff] %v582_v0  ;;  %v358_v0 = vld [vmem:[%s1308_s28 + $0x5f0] sm:$0xff]  ;;  %v615_v4 = vmul.f32 %v1315_v1, %v357_v62 }
  0xd1   : > { %839 = vst [vmem:[%s1327_s21 + $0x4e8] sm:$0xff] %v583_v3  ;;  %v359_v3 = vld [vmem:[%s1308_s28 + $0x5f8] sm:$0xff]  ;;  %v616_v6 = vmul.f32 %v1315_v1, %v358_v0 }
  0xd2   : > { %840 = vst [vmem:[%s1327_s21 + $0x4f0] sm:$0xff] %v584_v5  ;;  %v360_v5 = vld [vmem:[%s1308_s28 + $0x600] sm:$0xff]  ;;  %v617_v8 = vmul.f32 %v1315_v1, %v359_v3 }
  0xd3   : > { %841 = vst [vmem:[%s1327_s21 + $0x4f8] sm:$0xff] %v585_v7  ;;  %v361_v7 = vld [vmem:[%s1308_s28 + $0x608] sm:$0xff]  ;;  %v618_v10 = vmul.f32 %v1315_v1, %v360_v5 }
  0xd4   : > { %842 = vst [vmem:[%s1327_s21 + $0x500] sm:$0xff] %v586_v9  ;;  %v362_v9 = vld [vmem:[%s1308_s28 + $0x610] sm:$0xff]  ;;  %v619_v12 = vmul.f32 %v1315_v1, %v361_v7 }
  0xd5   : > { %843 = vst [vmem:[%s1327_s21 + $0x508] sm:$0xff] %v587_v11  ;;  %v363_v11 = vld [vmem:[%s1308_s28 + $0x618] sm:$0xff]  ;;  %v620_v14 = vmul.f32 %v1315_v1, %v362_v9 }
  0xd6   : > { %844 = vst [vmem:[%s1327_s21 + $0x510] sm:$0xff] %v588_v13  ;;  %v364_v13 = vld [vmem:[%s1308_s28 + $0x620] sm:$0xff]  ;;  %v621_v16 = vmul.f32 %v1315_v1, %v363_v11 }
  0xd7   : > { %845 = vst [vmem:[%s1327_s21 + $0x518] sm:$0xff] %v589_v15  ;;  %v365_v15 = vld [vmem:[%s1308_s28 + $0x628] sm:$0xff]  ;;  %v622_v18 = vmul.f32 %v1315_v1, %v364_v13 }
  0xd8   : > { %846 = vst [vmem:[%s1327_s21 + $0x520] sm:$0xff] %v590_v17  ;;  %v366_v17 = vld [vmem:[%s1308_s28 + $0x630] sm:$0xff]  ;;  %v623_v20 = vmul.f32 %v1315_v1, %v365_v15 }
  0xd9   : > { %847 = vst [vmem:[%s1327_s21 + $0x528] sm:$0xff] %v591_v19  ;;  %v367_v19 = vld [vmem:[%s1308_s28 + $0x638] sm:$0xff]  ;;  %v624_v22 = vmul.f32 %v1315_v1, %v366_v17 }
  0xda   : > { %848 = vst [vmem:[%s1327_s21 + $0x530] sm:$0xff] %v592_v21  ;;  %v368_v21 = vld [vmem:[%s1308_s28 + $0x640] sm:$0xff]  ;;  %v625_v24 = vmul.f32 %v1315_v1, %v367_v19 }
  0xdb   : > { %849 = vst [vmem:[%s1327_s21 + $0x538] sm:$0xff] %v593_v23  ;;  %v369_v23 = vld [vmem:[%s1308_s28 + $0x648] sm:$0xff]  ;;  %v626_v26 = vmul.f32 %v1315_v1, %v368_v21 }
  0xdc   : > { %850 = vst [vmem:[%s1327_s21 + $0x540] sm:$0xff] %v594_v25  ;;  %v370_v25 = vld [vmem:[%s1308_s28 + $0x650] sm:$0xff]  ;;  %v627_v28 = vmul.f32 %v1315_v1, %v369_v23 }
  0xdd   : > { %851 = vst [vmem:[%s1327_s21 + $0x548] sm:$0xff] %v595_v27  ;;  %v371_v27 = vld [vmem:[%s1308_s28 + $0x658] sm:$0xff]  ;;  %v628_v30 = vmul.f32 %v1315_v1, %v370_v25 }
  0xde   : > { %852 = vst [vmem:[%s1327_s21 + $0x550] sm:$0xff] %v596_v29  ;;  %v372_v29 = vld [vmem:[%s1308_s28 + $0x660] sm:$0xff]  ;;  %v629_v32 = vmul.f32 %v1315_v1, %v371_v27 }
  0xdf   : > { %853 = vst [vmem:[%s1327_s21 + $0x558] sm:$0xff] %v597_v31  ;;  %v373_v31 = vld [vmem:[%s1308_s28 + $0x668] sm:$0xff]  ;;  %v630_v34 = vmul.f32 %v1315_v1, %v372_v29 }
  0xe0   : > { %854 = vst [vmem:[%s1327_s21 + $0x560] sm:$0xff] %v598_v33  ;;  %v374_v33 = vld [vmem:[%s1308_s28 + $0x670] sm:$0xff]  ;;  %v631_v36 = vmul.f32 %v1315_v1, %v373_v31 }
  0xe1   : > { %855 = vst [vmem:[%s1327_s21 + $0x568] sm:$0xff] %v599_v35  ;;  %v375_v35 = vld [vmem:[%s1308_s28 + $0x678] sm:$0xff]  ;;  %v632_v38 = vmul.f32 %v1315_v1, %v374_v33 }
  0xe2   : > { %856 = vst [vmem:[%s1327_s21 + $0x570] sm:$0xff] %v600_v37  ;;  %v376_v37 = vld [vmem:[%s1308_s28 + $0x680] sm:$0xff]  ;;  %v633_v40 = vmul.f32 %v1315_v1, %v375_v35 }
  0xe3   : > { %857 = vst [vmem:[%s1327_s21 + $0x578] sm:$0xff] %v601_v39  ;;  %v377_v39 = vld [vmem:[%s1308_s28 + $0x688] sm:$0xff]  ;;  %v634_v42 = vmul.f32 %v1315_v1, %v376_v37 }
  0xe4   : > { %858 = vst [vmem:[%s1327_s21 + $0x580] sm:$0xff] %v602_v41  ;;  %v378_v41 = vld [vmem:[%s1308_s28 + $0x690] sm:$0xff]  ;;  %v635_v44 = vmul.f32 %v1315_v1, %v377_v39 }
  0xe5   : > { %859 = vst [vmem:[%s1327_s21 + $0x588] sm:$0xff] %v603_v43  ;;  %v379_v43 = vld [vmem:[%s1308_s28 + $0x698] sm:$0xff]  ;;  %v636_v46 = vmul.f32 %v1315_v1, %v378_v41 }
  0xe6   : > { %860 = vst [vmem:[%s1327_s21 + $0x590] sm:$0xff] %v604_v45  ;;  %v380_v45 = vld [vmem:[%s1308_s28 + $0x6a0] sm:$0xff]  ;;  %v637_v48 = vmul.f32 %v1315_v1, %v379_v43 }
  0xe7   : > { %861 = vst [vmem:[%s1327_s21 + $0x598] sm:$0xff] %v605_v47  ;;  %v381_v47 = vld [vmem:[%s1308_s28 + $0x6a8] sm:$0xff]  ;;  %v638_v50 = vmul.f32 %v1315_v1, %v380_v45 }
  0xe8   : > { %862 = vst [vmem:[%s1327_s21 + $0x5a0] sm:$0xff] %v606_v49  ;;  %v382_v49 = vld [vmem:[%s1308_s28 + $0x6b0] sm:$0xff]  ;;  %v639_v52 = vmul.f32 %v1315_v1, %v381_v47 }
  0xe9   : > { %863 = vst [vmem:[%s1327_s21 + $0x5a8] sm:$0xff] %v607_v51  ;;  %v383_v51 = vld [vmem:[%s1308_s28 + $0x6b8] sm:$0xff]  ;;  %v640_v54 = vmul.f32 %v1315_v1, %v382_v49 }
  0xea   : > { %864 = vst [vmem:[%s1327_s21 + $0x5b0] sm:$0xff] %v608_v53  ;;  %v384_v53 = vld [vmem:[%s1308_s28 + $0x6c0] sm:$0xff]  ;;  %v641_v56 = vmul.f32 %v1315_v1, %v383_v51 }
  0xeb   : > { %865 = vst [vmem:[%s1327_s21 + $0x5b8] sm:$0xff] %v609_v55  ;;  %v385_v55 = vld [vmem:[%s1308_s28 + $0x6c8] sm:$0xff]  ;;  %v642_v58 = vmul.f32 %v1315_v1, %v384_v53 }
  0xec   : > { %866 = vst [vmem:[%s1327_s21 + $0x5c0] sm:$0xff] %v610_v57  ;;  %v386_v57 = vld [vmem:[%s1308_s28 + $0x6d0] sm:$0xff]  ;;  %v643_v60 = vmul.f32 %v1315_v1, %v385_v55 }
  0xed   : > { %867 = vst [vmem:[%s1327_s21 + $0x5c8] sm:$0xff] %v611_v59  ;;  %v387_v59 = vld [vmem:[%s1308_s28 + $0x6d8] sm:$0xff]  ;;  %v644_v62 = vmul.f32 %v1315_v1, %v386_v57 }
  0xee   : > { %868 = vst [vmem:[%s1327_s21 + $0x5d0] sm:$0xff] %v612_v61  ;;  %v388_v61 = vld [vmem:[%s1308_s28 + $0x6e0] sm:$0xff]  ;;  %v645_v0 = vmul.f32 %v1315_v1, %v387_v59 }
  0xef   : > { %869 = vst [vmem:[%s1327_s21 + $0x5d8] sm:$0xff] %v613_v63  ;;  %v389_v63 = vld [vmem:[%s1308_s28 + $0x6e8] sm:$0xff]  ;;  %v646_v3 = vmul.f32 %v1315_v1, %v388_v61 }
  0xf0   : > { %870 = vst [vmem:[%s1327_s21 + $0x5e0] sm:$0xff] %v614_v2  ;;  %v390_v2 = vld [vmem:[%s1308_s28 + $0x6f0] sm:$0xff]  ;;  %v647_v5 = vmul.f32 %v1315_v1, %v389_v63 }
  0xf1   : > { %871 = vst [vmem:[%s1327_s21 + $0x5e8] sm:$0xff] %v615_v4  ;;  %v391_v4 = vld [vmem:[%s1308_s28 + $0x6f8] sm:$0xff]  ;;  %v648_v7 = vmul.f32 %v1315_v1, %v390_v2 }
  0xf2   : > { %872 = vst [vmem:[%s1327_s21 + $0x5f0] sm:$0xff] %v616_v6  ;;  %v392_v6 = vld [vmem:[%s1308_s28 + $0x700] sm:$0xff]  ;;  %v649_v9 = vmul.f32 %v1315_v1, %v391_v4 }
  0xf3   : > { %873 = vst [vmem:[%s1327_s21 + $0x5f8] sm:$0xff] %v617_v8  ;;  %v393_v8 = vld [vmem:[%s1308_s28 + $0x708] sm:$0xff]  ;;  %v650_v11 = vmul.f32 %v1315_v1, %v392_v6 }
  0xf4   : > { %874 = vst [vmem:[%s1327_s21 + $0x600] sm:$0xff] %v618_v10  ;;  %v394_v10 = vld [vmem:[%s1308_s28 + $0x710] sm:$0xff]  ;;  %v651_v13 = vmul.f32 %v1315_v1, %v393_v8 }
  0xf5   : > { %875 = vst [vmem:[%s1327_s21 + $0x608] sm:$0xff] %v619_v12  ;;  %v395_v12 = vld [vmem:[%s1308_s28 + $0x718] sm:$0xff]  ;;  %v652_v15 = vmul.f32 %v1315_v1, %v394_v10 }
  0xf6   : > { %876 = vst [vmem:[%s1327_s21 + $0x610] sm:$0xff] %v620_v14  ;;  %v396_v14 = vld [vmem:[%s1308_s28 + $0x720] sm:$0xff]  ;;  %v653_v17 = vmul.f32 %v1315_v1, %v395_v12 }
  0xf7   : > { %877 = vst [vmem:[%s1327_s21 + $0x618] sm:$0xff] %v621_v16  ;;  %v397_v16 = vld [vmem:[%s1308_s28 + $0x728] sm:$0xff]  ;;  %v654_v19 = vmul.f32 %v1315_v1, %v396_v14 }
  0xf8   : > { %878 = vst [vmem:[%s1327_s21 + $0x620] sm:$0xff] %v622_v18  ;;  %v398_v18 = vld [vmem:[%s1308_s28 + $0x730] sm:$0xff]  ;;  %v655_v21 = vmul.f32 %v1315_v1, %v397_v16 }
  0xf9   : > { %879 = vst [vmem:[%s1327_s21 + $0x628] sm:$0xff] %v623_v20  ;;  %v399_v20 = vld [vmem:[%s1308_s28 + $0x738] sm:$0xff]  ;;  %v656_v23 = vmul.f32 %v1315_v1, %v398_v18 }
  0xfa   : > { %880 = vst [vmem:[%s1327_s21 + $0x630] sm:$0xff] %v624_v22  ;;  %v400_v22 = vld [vmem:[%s1308_s28 + $0x740] sm:$0xff]  ;;  %v657_v25 = vmul.f32 %v1315_v1, %v399_v20 }
  0xfb   : > { %881 = vst [vmem:[%s1327_s21 + $0x638] sm:$0xff] %v625_v24  ;;  %v401_v24 = vld [vmem:[%s1308_s28 + $0x748] sm:$0xff]  ;;  %v658_v27 = vmul.f32 %v1315_v1, %v400_v22 }
  0xfc   : > { %882 = vst [vmem:[%s1327_s21 + $0x640] sm:$0xff] %v626_v26  ;;  %v402_v26 = vld [vmem:[%s1308_s28 + $0x750] sm:$0xff]  ;;  %v659_v29 = vmul.f32 %v1315_v1, %v401_v24 }
  0xfd   : > { %883 = vst [vmem:[%s1327_s21 + $0x648] sm:$0xff] %v627_v28  ;;  %v403_v28 = vld [vmem:[%s1308_s28 + $0x758] sm:$0xff]  ;;  %v660_v31 = vmul.f32 %v1315_v1, %v402_v26 }
  0xfe   : > { %884 = vst [vmem:[%s1327_s21 + $0x650] sm:$0xff] %v628_v30  ;;  %v404_v30 = vld [vmem:[%s1308_s28 + $0x760] sm:$0xff]  ;;  %v661_v33 = vmul.f32 %v1315_v1, %v403_v28 }
  0xff   : > { %885 = vst [vmem:[%s1327_s21 + $0x658] sm:$0xff] %v629_v32  ;;  %v405_v32 = vld [vmem:[%s1308_s28 + $0x768] sm:$0xff]  ;;  %v662_v35 = vmul.f32 %v1315_v1, %v404_v30 }
 0x100   : > { %886 = vst [vmem:[%s1327_s21 + $0x660] sm:$0xff] %v630_v34  ;;  %v406_v34 = vld [vmem:[%s1308_s28 + $0x770] sm:$0xff]  ;;  %v663_v37 = vmul.f32 %v1315_v1, %v405_v32 }
 0x101   : > { %887 = vst [vmem:[%s1327_s21 + $0x668] sm:$0xff] %v631_v36  ;;  %v407_v36 = vld [vmem:[%s1308_s28 + $0x778] sm:$0xff]  ;;  %v664_v39 = vmul.f32 %v1315_v1, %v406_v34 }
 0x102   : > { %888 = vst [vmem:[%s1327_s21 + $0x670] sm:$0xff] %v632_v38  ;;  %v408_v38 = vld [vmem:[%s1308_s28 + $0x780] sm:$0xff]  ;;  %v665_v41 = vmul.f32 %v1315_v1, %v407_v36 }
 0x103   : > { %889 = vst [vmem:[%s1327_s21 + $0x678] sm:$0xff] %v633_v40  ;;  %v409_v40 = vld [vmem:[%s1308_s28 + $0x788] sm:$0xff]  ;;  %v666_v43 = vmul.f32 %v1315_v1, %v408_v38 }
 0x104   : > { %890 = vst [vmem:[%s1327_s21 + $0x680] sm:$0xff] %v634_v42  ;;  %v410_v42 = vld [vmem:[%s1308_s28 + $0x790] sm:$0xff]  ;;  %v667_v45 = vmul.f32 %v1315_v1, %v409_v40 }
 0x105   : > { %891 = vst [vmem:[%s1327_s21 + $0x688] sm:$0xff] %v635_v44  ;;  %v411_v44 = vld [vmem:[%s1308_s28 + $0x798] sm:$0xff]  ;;  %v668_v47 = vmul.f32 %v1315_v1, %v410_v42 }
 0x106   : > { %892 = vst [vmem:[%s1327_s21 + $0x690] sm:$0xff] %v636_v46  ;;  %v412_v46 = vld [vmem:[%s1308_s28 + $0x7a0] sm:$0xff]  ;;  %v669_v49 = vmul.f32 %v1315_v1, %v411_v44 }
 0x107   : > { %893 = vst [vmem:[%s1327_s21 + $0x698] sm:$0xff] %v637_v48  ;;  %v413_v48 = vld [vmem:[%s1308_s28 + $0x7a8] sm:$0xff]  ;;  %v670_v51 = vmul.f32 %v1315_v1, %v412_v46 }
 0x108   : > { %894 = vst [vmem:[%s1327_s21 + $0x6a0] sm:$0xff] %v638_v50  ;;  %v414_v50 = vld [vmem:[%s1308_s28 + $0x7b0] sm:$0xff]  ;;  %v671_v53 = vmul.f32 %v1315_v1, %v413_v48 }
 0x109   : > { %895 = vst [vmem:[%s1327_s21 + $0x6a8] sm:$0xff] %v639_v52  ;;  %v415_v52 = vld [vmem:[%s1308_s28 + $0x7b8] sm:$0xff]  ;;  %v672_v55 = vmul.f32 %v1315_v1, %v414_v50 }
 0x10a   : > { %896 = vst [vmem:[%s1327_s21 + $0x6b0] sm:$0xff] %v640_v54  ;;  %v416_v54 = vld [vmem:[%s1308_s28 + $0x7c0] sm:$0xff]  ;;  %v673_v57 = vmul.f32 %v1315_v1, %v415_v52 }
 0x10b   : > { %897 = vst [vmem:[%s1327_s21 + $0x6b8] sm:$0xff] %v641_v56  ;;  %v417_v56 = vld [vmem:[%s1308_s28 + $0x7c8] sm:$0xff]  ;;  %v674_v59 = vmul.f32 %v1315_v1, %v416_v54 }
 0x10c   : > { %898 = vst [vmem:[%s1327_s21 + $0x6c0] sm:$0xff] %v642_v58  ;;  %v418_v58 = vld [vmem:[%s1308_s28 + $0x7d0] sm:$0xff]  ;;  %v675_v61 = vmul.f32 %v1315_v1, %v417_v56 }
 0x10d   : > { %899 = vst [vmem:[%s1327_s21 + $0x6c8] sm:$0xff] %v643_v60  ;;  %v419_v60 = vld [vmem:[%s1308_s28 + $0x7d8] sm:$0xff]  ;;  %v676_v63 = vmul.f32 %v1315_v1, %v418_v58 }
 0x10e   : > { %900 = vst [vmem:[%s1327_s21 + $0x6d0] sm:$0xff] %v644_v62  ;;  %v420_v62 = vld [vmem:[%s1308_s28 + $0x7e0] sm:$0xff]  ;;  %v677_v2 = vmul.f32 %v1315_v1, %v419_v60 }
 0x10f   : > { %901 = vst [vmem:[%s1327_s21 + $0x6d8] sm:$0xff] %v645_v0  ;;  %v421_v0 = vld [vmem:[%s1308_s28 + $0x7e8] sm:$0xff]  ;;  %v678_v4 = vmul.f32 %v1315_v1, %v420_v62 }
 0x110   : > { %902 = vst [vmem:[%s1327_s21 + $0x6e0] sm:$0xff] %v646_v3  ;;  %v422_v3 = vld [vmem:[%s1308_s28 + $0x7f0] sm:$0xff]  ;;  %v679_v6 = vmul.f32 %v1315_v1, %v421_v0 }
 0x111   : > { %903 = vst [vmem:[%s1327_s21 + $0x6e8] sm:$0xff] %v647_v5  ;;  %v423_v5 = vld [vmem:[%s1308_s28 + $0x7f8] sm:$0xff] }
 0x112   : > { %904 = vst [vmem:[%s1327_s21 + $0x6f0] sm:$0xff] %v648_v7  ;;  %v680_v7 = vmul.f32 %v1315_v1, %v422_v3  ;;  %v681_v8 = vmul.f32 %v1315_v1, %v423_v5 }
 0x113   : > { %905 = vst [vmem:[%s1327_s21 + $0x6f8] sm:$0xff] %v649_v9 }
 0x114   : > { %906 = vst [vmem:[%s1327_s21 + $0x700] sm:$0xff] %v650_v11 }
 0x115   : > { %907 = vst [vmem:[%s1327_s21 + $0x708] sm:$0xff] %v651_v13 }
 0x116   : > { %908 = vst [vmem:[%s1327_s21 + $0x710] sm:$0xff] %v652_v15 }
 0x117   : > { %909 = vst [vmem:[%s1327_s21 + $0x718] sm:$0xff] %v653_v17 }
 0x118   : > { %910 = vst [vmem:[%s1327_s21 + $0x720] sm:$0xff] %v654_v19 }
 0x119   : > { %911 = vst [vmem:[%s1327_s21 + $0x728] sm:$0xff] %v655_v21 }
 0x11a   : > { %912 = vst [vmem:[%s1327_s21 + $0x730] sm:$0xff] %v656_v23 }
 0x11b   : > { %913 = vst [vmem:[%s1327_s21 + $0x738] sm:$0xff] %v657_v25 }
 0x11c   : > { %914 = vst [vmem:[%s1327_s21 + $0x740] sm:$0xff] %v658_v27 }
 0x11d   : > { %915 = vst [vmem:[%s1327_s21 + $0x748] sm:$0xff] %v659_v29 }
 0x11e   : > { %916 = vst [vmem:[%s1327_s21 + $0x750] sm:$0xff] %v660_v31 }
 0x11f   : > { %917 = vst [vmem:[%s1327_s21 + $0x758] sm:$0xff] %v661_v33 }
 0x120   : > { %918 = vst [vmem:[%s1327_s21 + $0x760] sm:$0xff] %v662_v35 }
 0x121   : > { %919 = vst [vmem:[%s1327_s21 + $0x768] sm:$0xff] %v663_v37 }
 0x122   : > { %920 = vst [vmem:[%s1327_s21 + $0x770] sm:$0xff] %v664_v39 }
 0x123   : > { %921 = vst [vmem:[%s1327_s21 + $0x778] sm:$0xff] %v665_v41 }
 0x124   : > { %922 = vst [vmem:[%s1327_s21 + $0x780] sm:$0xff] %v666_v43 }
 0x125   : > { %923 = vst [vmem:[%s1327_s21 + $0x788] sm:$0xff] %v667_v45 }
 0x126   : > { %924 = vst [vmem:[%s1327_s21 + $0x790] sm:$0xff] %v668_v47 }
 0x127   : > { %925 = vst [vmem:[%s1327_s21 + $0x798] sm:$0xff] %v669_v49 }
 0x128   : > { %926 = vst [vmem:[%s1327_s21 + $0x7a0] sm:$0xff] %v670_v51 }
 0x129   : > { %927 = vst [vmem:[%s1327_s21 + $0x7a8] sm:$0xff] %v671_v53 }
 0x12a   : > { %928 = vst [vmem:[%s1327_s21 + $0x7b0] sm:$0xff] %v672_v55 }
 0x12b   : > { %929 = vst [vmem:[%s1327_s21 + $0x7b8] sm:$0xff] %v673_v57 }
 0x12c   : > { %930 = vst [vmem:[%s1327_s21 + $0x7c0] sm:$0xff] %v674_v59 }
 0x12d   : > { %931 = vst [vmem:[%s1327_s21 + $0x7c8] sm:$0xff] %v675_v61 }
 0x12e   : > { %932 = vst [vmem:[%s1327_s21 + $0x7d0] sm:$0xff] %v676_v63 }
 0x12f   : > { %933 = vst [vmem:[%s1327_s21 + $0x7d8] sm:$0xff] %v677_v2 }
 0x130   : > { %934 = vst [vmem:[%s1327_s21 + $0x7e0] sm:$0xff] %v678_v4 }
 0x131   : > { %935 = vst [vmem:[%s1327_s21 + $0x7e8] sm:$0xff] %v679_v6 }
 0x132   : > { %936 = vst [vmem:[%s1327_s21 + $0x7f0] sm:$0xff] %v680_v7 }
 0x133   : > { %937 = vst [vmem:[%s1327_s21 + $0x7f8] sm:$0xff] %v681_v8 }
 0x134   : > { %1155 = shalt.err (!%p1152_p4)
}
 0x135   : > { %s1198_s24 = smov 512   ;;  %s1199_s25 = smov 32  }
 0x136   : > { %1050 = dma.vmem_to_hbm [thread:$0]  (%p1268_p11), %s953_s5, 32768, %s955_s6, %s939_s7, %s1198_s24, %s1198_s24, %s1199_s25  }
 0x137 PF: > { %s969_s26 = sand.u32 1, %s1182_s11   ;;  %p2128_p7 = scmp.ge.s32.totalorder %s1194_s14, 2 }
 0x138   : > { %s970_s27 = scalar_lea.sflag [#allocation5], %s969_s26 }
 0x139   : > { %p1057_p5 = pnand %p2128_p7, %p1272_p12 }
 0x13b   : > { %p1058_p8 = pneg %p1057_p5 }
 0x13d   : > { %1177 = dma.done.wait (%p1058_p8), %s970_s27, 32768  }
 0x13e   : > { %1179 = vsyncadd (%p1058_p8), %s970_s27, 4294934528  ;;  %p16_p10 = scmp.ge.s32.totalorder %s1243_s16, 4   ;;  %s2129_s11 = smov %s1186_s12 }
 0x13f   : > { %s2130_s12 = smov %s1190_s13  ;;  %s2131_s13 = smov %s1255_s19 }
 0x140   : > { %s2132_s14 = smov %s1243_s16  ;;  %18 = sbr.rel (!%p16_p10) target bundleno = 7 (0x7), region = 73 }
 0x145   :  { %976 = vsyncpa [#allocation4], 1 }
 0x146   :  { %978 = vsyncpa [#allocation4 + $0x1], 1 }
 0x147   :  { %979 = vsyncpa [#allocation5], 1 }
 0x148   :  { %981 = vsyncpa [#allocation5 + $0x1], 1 }

</bundles_post_ra>
